<compile_context>
chip_gen: v7x
topology: tpu7x:2x2x1
jax: 0.10.0
libtpu: 0.0.40
codegen_flags: <defaults>
</compile_context>

<pallas_src>
import jax
import jax.numpy as jnp
from jax import lax
from jax.experimental import pallas as pl
from jax.experimental.pallas import tpu as pltpu

MAX_SINKHORN_ITERS = 100   # TODO(synk): torch uses an unbounded `while`; capped here.
SINKHORN_EPS = 1e-6        # 1e-8 is below the f32 ULP near colsum~1; this one can fire.
INNER_UNROLL = 5           # Sinkhorn updates per convergence check (100 / 5 = 20 checks max).


def _recip(x):
    # EUP approx reciprocal + one Newton step -> ~f32-exact, no VALU divide,
    # and keeps the convergence test meaningful at EPS=1e-6.
    r = pl.reciprocal(x, approx=True)
    return r * (2.0 - x * r)


def _linear_assignment_kernel(x_ref, w_ref, b_ref, logits_ref):
    # x_ref:      (A, N, Bt) f32 VMEM -- Bt independent Sinkhorn problems, one per lane.
    # w_ref:      (N,)  f32 SMEM scalars (Categorical head weight).
    # b_ref:      (1,)  f32 SMEM scalar (Categorical head bias).
    # logits_ref: (A, Bt) f32 VMEM -- lane-dense output slab.
    P0 = x_ref[...]
    A, N, Bt = P0.shape
    u0 = jnp.zeros((N, Bt), jnp.float32)       # previous column sums (one vreg)

    def sinkhorn_step(_, st):
        P, _u = st
        colsum = jnp.sum(P, axis=0)                        # (N, Bt)  one vreg
        P = P * _recip(colsum)[None, :, :]                 # column normalize
        rowsum = jnp.sum(P, axis=1)                        # (A, Bt)  one vreg -> 1 vrcp
        P = P * _recip(rowsum)[:, None, :]                 # row normalize
        return P, colsum                                   # colsum == u before last norm

    def cond(carry):
        return carry[2]

    def body(carry):
        it, (P, u), _ = carry
        # K straight-line updates between checks: amortizes the cross-lane reduce
        # and the vector->scalar readback that feeds the while condition.
        P, u = lax.fori_loop(0, INNER_UNROLL, sinkhorn_step, (P, u), unroll=True)
        it = it + INNER_UNROLL
        # torch condition: max|u_prev - colsum(P)| > eps (block-wide; converged
        # lanes just keep renormalizing at their fixed point, a no-op).
        err = jnp.max(jnp.abs(u - jnp.sum(P, axis=0)))
        keep = jnp.logical_and(it < MAX_SINKHORN_ITERS, err > SINKHORN_EPS)
        return it, (P, u), keep

    _, (P, _), _ = lax.while_loop(cond, body, (jnp.int32(0), (P0, u0), jnp.bool_(True)))

    # Categorical(N, 1) linear head: logits[a, b] = sum_n w[n] * P[a, n, b] + bias.
    # Weight is N SMEM scalars -> unrolled scalar * vector accumulation.
    acc = jnp.zeros((A, Bt), jnp.float32) + b_ref[0]
    for n in range(N):
        acc = acc + w_ref[n] * P[:, n, :]
    logits_ref[...] = acc


def _default_block_b():
    # v7x has 2 TensorCores/chip: keep 128-lane blocks so >=2 "parallel" grid
    # steps shard across cores.  Single-TC v5e/v6e: fewer, fuller 256-lane blocks.
    try:
        kind = jax.devices()[0].device_kind.lower()
    except Exception:
        return 128
    return 128 if "v7" in kind else 256


def linear_assignment_forward(x, weight, bias, available_actions=None,
                              deterministic=False, *, block_b=None):
    """x: (B, A, N) f32; weight: (1, N); bias: (1, 1).
    Returns (actions, action_log_probs), each (B*A, 1) f32, matching the PyTorch
    module's forward(): a 1-class Categorical always samples action 0 with
    log-prob 0 (so `deterministic` is a no-op)."""
    # TODO(synk): available_actions masking (logits[mask==0] = -1e10) not wired;
    # it cannot change the outputs of a 1-class Categorical anyway.
    del available_actions, deterministic
    B, A, N = x.shape
    if block_b is None:
        block_b = _default_block_b()
    bt = min(block_b, B)                     # batches packed per grid step (lane axis)
    n_blocks = pl.cdiv(B, bt)
    Bp = n_blocks * bt

    # Batch on the last (lane) axis: (A, N, B).  The transpose is a wrapper-side
    # XLA op; negligible at small B — produce activations in this layout upstream
    # if B gets large or this is called in a tight loop.
    xt = jnp.transpose(x.astype(jnp.float32), (1, 2, 0))
    if Bp != B:
        # Pad with all-ones matrices: well conditioned, converge in a couple of
        # iterations, padded lanes are sliced away below.
        xt = jnp.concatenate([xt, jnp.ones((A, N, Bp - B), jnp.float32)], axis=-1)

    w = jnp.asarray(weight, jnp.float32).reshape(N)
    b = jnp.asarray(bias, jnp.float32).reshape(1)

    logits_packed = pl.pallas_call(
        _linear_assignment_kernel,
        out_shape=jax.ShapeDtypeStruct((A, Bp), jnp.float32),
        grid=(n_blocks,),
        in_specs=[
            pl.BlockSpec((A, N, bt), lambda i: (0, 0, i)),
            pl.BlockSpec(memory_space=pltpu.MemorySpace.SMEM),   # weight: N scalars
            pl.BlockSpec(memory_space=pltpu.MemorySpace.SMEM),   # bias scalar
        ],
        out_specs=pl.BlockSpec((A, bt), lambda i: (0, i)),
        compiler_params=pltpu.CompilerParams(dimension_semantics=("parallel",)),
    )(xt, w, b)

    # (A, Bp) -> (B, A) -> (B*A, 1); matches torch.flatten(actions).unsqueeze(1) order.
    logits = logits_packed[:, :B].T.reshape(B * A, 1)
    # 1-class categorical: log_softmax over the single class is exactly 0 and
    # sample() == mode() == 0 (torch stores the sample into a float tensor).
    action_log_probs = logits - jax.nn.logsumexp(logits, axis=-1, keepdims=True)
    actions = jnp.zeros_like(action_log_probs)
    return actions, action_log_probs


if __name__ == "__main__":
    key = jax.random.PRNGKey(0)
    k_x, k_w = jax.random.split(key)

    # batch, num_agents, num_actions; B=256 -> one 256-lane block on v5e/v6e,
    # two "parallel" 128-lane blocks on v7x.
    B, A, N = 256, 8, 8
    # Strictly positive scores so Sinkhorn normalization is well defined.
    x = jax.random.uniform(k_x, (B, A, N), jnp.float32, minval=0.1, maxval=1.1)

    # Categorical(N, 1) parameters: orthogonal init (gain 0.01), zero bias —
    # deterministic synthetic init, no checkpoint load.
    weight = jax.nn.initializers.orthogonal(scale=0.01)(k_w, (1, N), jnp.float32)
    bias = jnp.zeros((1, 1), jnp.float32)

    actions, action_log_probs = linear_assignment_forward(x, weight, bias)
    jax.block_until_ready((actions, action_log_probs))

    assert actions.shape == (B * A, 1), actions.shape
    assert action_log_probs.shape == (B * A, 1), action_log_probs.shape
    assert bool(jnp.all(jnp.isfinite(action_log_probs)))
    assert bool(jnp.all(actions == 0.0))
    assert bool(jnp.all(action_log_probs == 0.0))
    print("KERNEL_OK")
</pallas_src>

<mosaic_0001>
module attributes {stable_mosaic.version = 11 : i64} {
  func.func @_linear_assignment_kernel(%arg0: i32, %arg1: memref<8x8x256xf32, #tpu.memory_space<vmem>>, %arg2: memref<8xf32, #tpu.memory_space<smem>>, %arg3: memref<1xf32, #tpu.memory_space<smem>>, %arg4: memref<8x256xf32, #tpu.memory_space<vmem>>) attributes {dimension_semantics = [#tpu.dimension_semantics<parallel>], iteration_bounds = array<i64: 1>, scalar_prefetch = 0 : i64, scratch_operands = 0 : i64, tpu.core_type = #tpu.core_type<tc>, window_params = [{transform_indices = @transform_0, window_bounds = array<i64: 8, 8, 256>}, {transform_indices = @transform_1, window_bounds = array<i64: 8>}, {transform_indices = @transform_2, window_bounds = array<i64: 1>}, {transform_indices = @transform_3, window_bounds = array<i64: 8, 256>}]} {
    %c0 = arith.constant 0 : index
    %c0_0 = arith.constant 0 : index
    %c0_1 = arith.constant 0 : index
    %0 = vector.load %arg1[%c0, %c0_0, %c0_1] : memref<8x8x256xf32, #tpu.memory_space<vmem>>, vector<8x8x256xf32>
    %cst = arith.constant 0.000000e+00 : f32
    %1 = vector.broadcast %cst : f32 to vector<8x256xf32>
    %c0_i32 = arith.constant 0 : i32
    %true = arith.constant true
    %2:4 = scf.while (%arg5 = %c0_i32, %arg6 = %0, %arg7 = %1, %arg8 = %true) : (i32, vector<8x8x256xf32>, vector<8x256xf32>, i1) -> (i32, vector<8x8x256xf32>, vector<8x256xf32>, i1) {
      scf.condition(%arg8) %arg5, %arg6, %arg7, %arg8 : i32, vector<8x8x256xf32>, vector<8x256xf32>, i1
    } do {
    ^bb0(%arg5: i32, %arg6: vector<8x8x256xf32>, %arg7: vector<8x256xf32>, %arg8: i1):
      %c0_i32_7 = arith.constant 0 : i32
      %cst_8 = arith.constant dense<0.000000e+00> : vector<8x256xf32>
      %56 = vector.multi_reduction <add>, %arg6, %cst_8 [0] : vector<8x8x256xf32> to vector<8x256xf32>
      %57 = tpu.reciprocal %56 {approx = true} : vector<8x256xf32> -> vector<8x256xf32>
      %58 = arith.mulf %56, %57 : vector<8x256xf32>
      %cst_9 = arith.constant 2.000000e+00 : f32
      %59 = vector.broadcast %cst_9 : f32 to vector<8x256xf32>
      %60 = arith.subf %59, %58 : vector<8x256xf32>
      %61 = arith.mulf %57, %60 : vector<8x256xf32>
      %62 = vector.shape_cast %61 : vector<8x256xf32> to vector<1x8x256xf32>
      %63 = vector.broadcast %62 : vector<1x8x256xf32> to vector<8x8x256xf32>
      %64 = arith.mulf %arg6, %63 : vector<8x8x256xf32>
      %cst_10 = arith.constant dense<0.000000e+00> : vector<8x256xf32>
      %65 = vector.multi_reduction <add>, %64, %cst_10 [1] : vector<8x8x256xf32> to vector<8x256xf32>
      %66 = tpu.reciprocal %65 {approx = true} : vector<8x256xf32> -> vector<8x256xf32>
      %67 = arith.mulf %65, %66 : vector<8x256xf32>
      %cst_11 = arith.constant 2.000000e+00 : f32
      %68 = vector.broadcast %cst_11 : f32 to vector<8x256xf32>
      %69 = arith.subf %68, %67 : vector<8x256xf32>
      %70 = arith.mulf %66, %69 : vector<8x256xf32>
      %71 = vector.shape_cast %70 : vector<8x256xf32> to vector<8x1x256xf32>
      %72 = vector.broadcast %71 : vector<8x1x256xf32> to vector<8x8x256xf32>
      %73 = arith.mulf %64, %72 : vector<8x8x256xf32>
      %c1_i32 = arith.constant 1 : i32
      %cst_12 = arith.constant dense<0.000000e+00> : vector<8x256xf32>
      %74 = vector.multi_reduction <add>, %73, %cst_12 [0] : vector<8x8x256xf32> to vector<8x256xf32>
      %75 = tpu.reciprocal %74 {approx = true} : vector<8x256xf32> -> vector<8x256xf32>
      %76 = arith.mulf %74, %75 : vector<8x256xf32>
      %cst_13 = arith.constant 2.000000e+00 : f32
      %77 = vector.broadcast %cst_13 : f32 to vector<8x256xf32>
      %78 = arith.subf %77, %76 : vector<8x256xf32>
      %79 = arith.mulf %75, %78 : vector<8x256xf32>
      %80 = vector.shape_cast %79 : vector<8x256xf32> to vector<1x8x256xf32>
      %81 = vector.broadcast %80 : vector<1x8x256xf32> to vector<8x8x256xf32>
      %82 = arith.mulf %73, %81 : vector<8x8x256xf32>
      %cst_14 = arith.constant dense<0.000000e+00> : vector<8x256xf32>
      %83 = vector.multi_reduction <add>, %82, %cst_14 [1] : vector<8x8x256xf32> to vector<8x256xf32>
      %84 = tpu.reciprocal %83 {approx = true} : vector<8x256xf32> -> vector<8x256xf32>
      %85 = arith.mulf %83, %84 : vector<8x256xf32>
      %cst_15 = arith.constant 2.000000e+00 : f32
      %86 = vector.broadcast %cst_15 : f32 to vector<8x256xf32>
      %87 = arith.subf %86, %85 : vector<8x256xf32>
      %88 = arith.mulf %84, %87 : vector<8x256xf32>
      %89 = vector.shape_cast %88 : vector<8x256xf32> to vector<8x1x256xf32>
      %90 = vector.broadcast %89 : vector<8x1x256xf32> to vector<8x8x256xf32>
      %91 = arith.mulf %82, %90 : vector<8x8x256xf32>
      %c2_i32 = arith.constant 2 : i32
      %cst_16 = arith.constant dense<0.000000e+00> : vector<8x256xf32>
      %92 = vector.multi_reduction <add>, %91, %cst_16 [0] : vector<8x8x256xf32> to vector<8x256xf32>
      %93 = tpu.reciprocal %92 {approx = true} : vector<8x256xf32> -> vector<8x256xf32>
      %94 = arith.mulf %92, %93 : vector<8x256xf32>
      %cst_17 = arith.constant 2.000000e+00 : f32
      %95 = vector.broadcast %cst_17 : f32 to vector<8x256xf32>
      %96 = arith.subf %95, %94 : vector<8x256xf32>
      %97 = arith.mulf %93, %96 : vector<8x256xf32>
      %98 = vector.shape_cast %97 : vector<8x256xf32> to vector<1x8x256xf32>
      %99 = vector.broadcast %98 : vector<1x8x256xf32> to vector<8x8x256xf32>
      %100 = arith.mulf %91, %99 : vector<8x8x256xf32>
      %cst_18 = arith.constant dense<0.000000e+00> : vector<8x256xf32>
      %101 = vector.multi_reduction <add>, %100, %cst_18 [1] : vector<8x8x256xf32> to vector<8x256xf32>
      %102 = tpu.reciprocal %101 {approx = true} : vector<8x256xf32> -> vector<8x256xf32>
      %103 = arith.mulf %101, %102 : vector<8x256xf32>
      %cst_19 = arith.constant 2.000000e+00 : f32
      %104 = vector.broadcast %cst_19 : f32 to vector<8x256xf32>
      %105 = arith.subf %104, %103 : vector<8x256xf32>
      %106 = arith.mulf %102, %105 : vector<8x256xf32>
      %107 = vector.shape_cast %106 : vector<8x256xf32> to vector<8x1x256xf32>
      %108 = vector.broadcast %107 : vector<8x1x256xf32> to vector<8x8x256xf32>
      %109 = arith.mulf %100, %108 : vector<8x8x256xf32>
      %c3_i32 = arith.constant 3 : i32
      %cst_20 = arith.constant dense<0.000000e+00> : vector<8x256xf32>
      %110 = vector.multi_reduction <add>, %109, %cst_20 [0] : vector<8x8x256xf32> to vector<8x256xf32>
      %111 = tpu.reciprocal %110 {approx = true} : vector<8x256xf32> -> vector<8x256xf32>
      %112 = arith.mulf %110, %111 : vector<8x256xf32>
      %cst_21 = arith.constant 2.000000e+00 : f32
      %113 = vector.broadcast %cst_21 : f32 to vector<8x256xf32>
      %114 = arith.subf %113, %112 : vector<8x256xf32>
      %115 = arith.mulf %111, %114 : vector<8x256xf32>
      %116 = vector.shape_cast %115 : vector<8x256xf32> to vector<1x8x256xf32>
      %117 = vector.broadcast %116 : vector<1x8x256xf32> to vector<8x8x256xf32>
      %118 = arith.mulf %109, %117 : vector<8x8x256xf32>
      %cst_22 = arith.constant dense<0.000000e+00> : vector<8x256xf32>
      %119 = vector.multi_reduction <add>, %118, %cst_22 [1] : vector<8x8x256xf32> to vector<8x256xf32>
      %120 = tpu.reciprocal %119 {approx = true} : vector<8x256xf32> -> vector<8x256xf32>
      %121 = arith.mulf %119, %120 : vector<8x256xf32>
      %cst_23 = arith.constant 2.000000e+00 : f32
      %122 = vector.broadcast %cst_23 : f32 to vector<8x256xf32>
      %123 = arith.subf %122, %121 : vector<8x256xf32>
      %124 = arith.mulf %120, %123 : vector<8x256xf32>
      %125 = vector.shape_cast %124 : vector<8x256xf32> to vector<8x1x256xf32>
      %126 = vector.broadcast %125 : vector<8x1x256xf32> to vector<8x8x256xf32>
      %127 = arith.mulf %118, %126 : vector<8x8x256xf32>
      %c4_i32 = arith.constant 4 : i32
      %cst_24 = arith.constant dense<0.000000e+00> : vector<8x256xf32>
      %128 = vector.multi_reduction <add>, %127, %cst_24 [0] : vector<8x8x256xf32> to vector<8x256xf32>
      %129 = tpu.reciprocal %128 {approx = true} : vector<8x256xf32> -> vector<8x256xf32>
      %130 = arith.mulf %128, %129 : vector<8x256xf32>
      %cst_25 = arith.constant 2.000000e+00 : f32
      %131 = vector.broadcast %cst_25 : f32 to vector<8x256xf32>
      %132 = arith.subf %131, %130 : vector<8x256xf32>
      %133 = arith.mulf %129, %132 : vector<8x256xf32>
      %134 = vector.shape_cast %133 : vector<8x256xf32> to vector<1x8x256xf32>
      %135 = vector.broadcast %134 : vector<1x8x256xf32> to vector<8x8x256xf32>
      %136 = arith.mulf %127, %135 : vector<8x8x256xf32>
      %cst_26 = arith.constant dense<0.000000e+00> : vector<8x256xf32>
      %137 = vector.multi_reduction <add>, %136, %cst_26 [1] : vector<8x8x256xf32> to vector<8x256xf32>
      %138 = tpu.reciprocal %137 {approx = true} : vector<8x256xf32> -> vector<8x256xf32>
      %139 = arith.mulf %137, %138 : vector<8x256xf32>
      %cst_27 = arith.constant 2.000000e+00 : f32
      %140 = vector.broadcast %cst_27 : f32 to vector<8x256xf32>
      %141 = arith.subf %140, %139 : vector<8x256xf32>
      %142 = arith.mulf %138, %141 : vector<8x256xf32>
      %143 = vector.shape_cast %142 : vector<8x256xf32> to vector<8x1x256xf32>
      %144 = vector.broadcast %143 : vector<8x1x256xf32> to vector<8x8x256xf32>
      %145 = arith.mulf %136, %144 : vector<8x8x256xf32>
      %c5_i32 = arith.constant 5 : i32
      %c5_i32_28 = arith.constant 5 : i32
      %146 = arith.addi %arg5, %c5_i32_28 : i32
      %cst_29 = arith.constant dense<0.000000e+00> : vector<8x256xf32>
      %147 = vector.multi_reduction <add>, %145, %cst_29 [0] : vector<8x8x256xf32> to vector<8x256xf32>
      %148 = arith.subf %128, %147 : vector<8x256xf32>
      %149 = math.absf %148 : vector<8x256xf32>
      %150 = vector.shape_cast %149 : vector<8x256xf32> to vector<1x8x256xf32>
      %cst_30 = arith.constant dense<0xFF800000> : vector<1xf32>
      %151 = vector.multi_reduction <maximumf>, %150, %cst_30 [1, 2] : vector<1x8x256xf32> to vector<1xf32>
      %152 = vector.shape_cast %151 : vector<1xf32> to vector<1x1x1xf32>
      %153 = vector.extract %152[0, 0, 0] : f32 from vector<1x1x1xf32>
      %c100_i32 = arith.constant 100 : i32
      %154 = arith.cmpi slt, %146, %c100_i32 : i32
      %cst_31 = arith.constant 9.99999997E-7 : f32
      %155 = arith.cmpf ogt, %153, %cst_31 : f32
      %156 = arith.andi %154, %155 : i1
      scf.yield %146, %145, %128, %156 : i32, vector<8x8x256xf32>, vector<8x256xf32>, i1
    }
    %cst_2 = arith.constant 0.000000e+00 : f32
    %3 = vector.broadcast %cst_2 : f32 to vector<8x256xf32>
    %c0_3 = arith.constant 0 : index
    %4 = memref.load %arg3[%c0_3] : memref<1xf32, #tpu.memory_space<smem>>
    %5 = vector.broadcast %4 : f32 to vector<8x256xf32>
    %6 = arith.addf %3, %5 : vector<8x256xf32>
    %c0_4 = arith.constant 0 : index
    %7 = memref.load %arg2[%c0_4] : memref<8xf32, #tpu.memory_space<smem>>
    %8 = vector.extract_strided_slice %2#1 {offsets = [0, 0, 0], sizes = [8, 1, 256], strides = [1, 1, 1]} : vector<8x8x256xf32> to vector<8x1x256xf32>
    %9 = vector.shape_cast %8 : vector<8x1x256xf32> to vector<8x256xf32>
    %10 = vector.broadcast %7 : f32 to vector<8x256xf32>
    %11 = arith.mulf %10, %9 : vector<8x256xf32>
    %12 = arith.addf %6, %11 : vector<8x256xf32>
    %c1 = arith.constant 1 : index
    %13 = memref.load %arg2[%c1] : memref<8xf32, #tpu.memory_space<smem>>
    %14 = vector.extract_strided_slice %2#1 {offsets = [0, 1, 0], sizes = [8, 1, 256], strides = [1, 1, 1]} : vector<8x8x256xf32> to vector<8x1x256xf32>
    %15 = vector.shape_cast %14 : vector<8x1x256xf32> to vector<8x256xf32>
    %16 = vector.broadcast %13 : f32 to vector<8x256xf32>
    %17 = arith.mulf %16, %15 : vector<8x256xf32>
    %18 = arith.addf %12, %17 : vector<8x256xf32>
    %c2 = arith.constant 2 : index
    %19 = memref.load %arg2[%c2] : memref<8xf32, #tpu.memory_space<smem>>
    %20 = vector.extract_strided_slice %2#1 {offsets = [0, 2, 0], sizes = [8, 1, 256], strides = [1, 1, 1]} : vector<8x8x256xf32> to vector<8x1x256xf32>
    %21 = vector.shape_cast %20 : vector<8x1x256xf32> to vector<8x256xf32>
    %22 = vector.broadcast %19 : f32 to vector<8x256xf32>
    %23 = arith.mulf %22, %21 : vector<8x256xf32>
    %24 = arith.addf %18, %23 : vector<8x256xf32>
    %c3 = arith.constant 3 : index
    %25 = memref.load %arg2[%c3] : memref<8xf32, #tpu.memory_space<smem>>
    %26 = vector.extract_strided_slice %2#1 {offsets = [0, 3, 0], sizes = [8, 1, 256], strides = [1, 1, 1]} : vector<8x8x256xf32> to vector<8x1x256xf32>
    %27 = vector.shape_cast %26 : vector<8x1x256xf32> to vector<8x256xf32>
    %28 = vector.broadcast %25 : f32 to vector<8x256xf32>
    %29 = arith.mulf %28, %27 : vector<8x256xf32>
    %30 = arith.addf %24, %29 : vector<8x256xf32>
    %c4 = arith.constant 4 : index
    %31 = memref.load %arg2[%c4] : memref<8xf32, #tpu.memory_space<smem>>
    %32 = vector.extract_strided_slice %2#1 {offsets = [0, 4, 0], sizes = [8, 1, 256], strides = [1, 1, 1]} : vector<8x8x256xf32> to vector<8x1x256xf32>
    %33 = vector.shape_cast %32 : vector<8x1x256xf32> to vector<8x256xf32>
    %34 = vector.broadcast %31 : f32 to vector<8x256xf32>
    %35 = arith.mulf %34, %33 : vector<8x256xf32>
    %36 = arith.addf %30, %35 : vector<8x256xf32>
    %c5 = arith.constant 5 : index
    %37 = memref.load %arg2[%c5] : memref<8xf32, #tpu.memory_space<smem>>
    %38 = vector.extract_strided_slice %2#1 {offsets = [0, 5, 0], sizes = [8, 1, 256], strides = [1, 1, 1]} : vector<8x8x256xf32> to vector<8x1x256xf32>
    %39 = vector.shape_cast %38 : vector<8x1x256xf32> to vector<8x256xf32>
    %40 = vector.broadcast %37 : f32 to vector<8x256xf32>
    %41 = arith.mulf %40, %39 : vector<8x256xf32>
    %42 = arith.addf %36, %41 : vector<8x256xf32>
    %c6 = arith.constant 6 : index
    %43 = memref.load %arg2[%c6] : memref<8xf32, #tpu.memory_space<smem>>
    %44 = vector.extract_strided_slice %2#1 {offsets = [0, 6, 0], sizes = [8, 1, 256], strides = [1, 1, 1]} : vector<8x8x256xf32> to vector<8x1x256xf32>
    %45 = vector.shape_cast %44 : vector<8x1x256xf32> to vector<8x256xf32>
    %46 = vector.broadcast %43 : f32 to vector<8x256xf32>
    %47 = arith.mulf %46, %45 : vector<8x256xf32>
    %48 = arith.addf %42, %47 : vector<8x256xf32>
    %c7 = arith.constant 7 : index
    %49 = memref.load %arg2[%c7] : memref<8xf32, #tpu.memory_space<smem>>
    %50 = vector.extract_strided_slice %2#1 {offsets = [0, 7, 0], sizes = [8, 1, 256], strides = [1, 1, 1]} : vector<8x8x256xf32> to vector<8x1x256xf32>
    %51 = vector.shape_cast %50 : vector<8x1x256xf32> to vector<8x256xf32>
    %52 = vector.broadcast %49 : f32 to vector<8x256xf32>
    %53 = arith.mulf %52, %51 : vector<8x256xf32>
    %54 = arith.addf %48, %53 : vector<8x256xf32>
    %c0_5 = arith.constant 0 : index
    %c0_6 = arith.constant 0 : index
    %55 = vector.load %arg4[%c0_5, %c0_6] : memref<8x256xf32, #tpu.memory_space<vmem>>, vector<8x256xf32>
    tpu.vector_store %arg4[%c0_5, %c0_6], %54 {strides = array<i32>} : memref<8x256xf32, #tpu.memory_space<vmem>>, vector<8x256xf32>,
    return
  }
  func.func @transform_0(%arg0: i32) -> (i32, i32, i32) {
    %c0_i32 = arith.constant 0 : i32
    %c0_i32_0 = arith.constant 0 : i32
    %c0_i32_1 = arith.constant 0 : i32
    return %c0_i32, %c0_i32_0, %arg0 : i32, i32, i32
  }
  func.func @transform_1(%arg0: i32) -> i32 {
    %c0_i32 = arith.constant 0 : i32
    %c0_i32_0 = arith.constant 0 : i32
    return %c0_i32 : i32
  }
  func.func @transform_2(%arg0: i32) -> i32 {
    %c0_i32 = arith.constant 0 : i32
    %c0_i32_0 = arith.constant 0 : i32
    return %c0_i32 : i32
  }
  func.func @transform_3(%arg0: i32) -> (i32, i32) {
    %c0_i32 = arith.constant 0 : i32
    %c0_i32_0 = arith.constant 0 : i32
    return %c0_i32, %arg0 : i32, i32
  }
}

</mosaic_0001>

<bundles_post_ra>
// kernel: tpu_custom_call.1
= control target key start
LH: loop header
LB: loop body
LE: loop exit
PB: predicated region body
PF: predicated region fallthrough
CT: control target
= control target key end

     0   :  { %s3377_s0 = inlined_call_operand.hbm [shape: f32[8,8,256], index: 0, kind: input, shape index: {}]   ;;  %s3378_s1 = inlined_call_operand.vmem [shape: f32[8], index: 1, kind: input, shape index: {}]   ;;  %s3379_s2 = inlined_call_operand.<no memory space> [shape: f32[1], index: 2, kind: input, shape index: {}]   ;;  %s3380_s3 = inlined_call_operand.hbm [shape: f32[8,256], index: 3, kind: output, shape index: {}]  }
   0x1   :  { %8 = sst [smem:[#allocation2]] %s3379_s2 }
   0x2   :  { %9 = vsyncpa [#allocation4], 0 }
   0x3   :  { %10 = vsyncpa [#allocation6], 0 }
   0x4   :  { %11 = vsyncpa [#allocation5], 0  ;;  %s2448_s14 = smov [#allocation3]   ;;  %s30_s18 = sshll.u32 %s3378_s1, 4  ;;  %s31_s18 = int_to_ptr.vmem [resolvable:$true] %s30_s18 }
   0x5   :  { %s17_s15 = sshll.u32 %s2448_s14, 4  ;;  %s2250_s21 = scalar_lea.hbm %s3377_s0, 2048  ;;  %s18_s15 = int_to_ptr.vmem [resolvable:$true] %s17_s15 }
   0x6   :  { %p2251_p0 = scmp.ne.s32.totalorder %s3377_s0, %s2250_s21  ;;  %p2254_p1 = scmp.lt.u32.totalorder %s2250_s21, %s3377_s0 }
   0x8   :  { %p2256_p2 = pnand %p2254_p1, %p2251_p0 }
   0xa   :  { %2259 = shalt.err (!%p2256_p2)
}
   0xb   :  { %s2260_s25 = scalar_lea.vmem %s18_s15, 2048  ;;  %p2265_p4 = scmp.lt.s32.totalorder %s18_s15, %s18_s15 }
   0xc   :  { %p2261_p3 = scmp.ne.s32.totalorder %s18_s15, %s2260_s25  ;;  %p2266_p5 = scmp.lt.s32.totalorder %s2260_s25, %s2260_s25 }
   0xe   :  { %p2267_p6 = por %p2266_p5, %p2265_p4 }
  0x10   :  { %p2268_p7 = pnand %p2267_p6, %p2261_p3 }
  0x12   :  { %2271 = shalt.err (!%p2268_p7)
}
  0x13   :  { %s2449_s1 = smov 256   ;;  %s2450_s26 = smov 16  }
  0x14   :  { %23 = dma.hbm_to_vmem [thread:$0]  %s3377_s0, 2048, %s18_s15, [#allocation4], %s2449_s1, %s2449_s1, %s2450_s26  }
  0x15   :  { %s2272_s29 = scalar_lea.vmem %s31_s18, 16  ;;  %p2277_p9 = scmp.lt.s32.totalorder %s31_s18, %s31_s18 }
  0x16   :  { %p2273_p8 = scmp.ne.s32.totalorder %s31_s18, %s2272_s29  ;;  %p2278_p10 = scmp.lt.s32.totalorder %s2272_s29, %s2272_s29 }
  0x18   :  { %p2279_p11 = por %p2278_p10, %p2277_p9 }
  0x1a   :  { %p2280_p12 = pnand %p2279_p11, %p2273_p8 }
  0x1c   :  { %2283 = shalt.err (!%p2280_p12)
}
  0x1d   :  { %s2451_s30 = smov [#allocation7]  }
  0x1e   :  { %33 = dma.vmem_to_smem %s31_s18, 16, %s2451_s30, [#allocation6]  }
  0x1f   :  { %2374 = dma.done.wait [#allocation4], 2048  }
  0x20   :  { %2375 = vsyncadd [#allocation4], 4294965248 }
  0x21   :  { %2376 = dma.done.wait [#allocation6], 16  }
  0x22   :  { %2377 = vsyncadd [#allocation6], 4294967280 }
  0x23   :  { %42 = sfence }
  0x24   :  { %v43_v0 = vld [vmem:[#allocation3] sm:$0xff]   ;;  %v44_v1 = vld [vmem:[#allocation3 + $0x8] sm:$0xff]   ;;  %v45_v2 = vld [vmem:[#allocation3 + $0x10] sm:$0xff]   ;;  %s2523_s0 = smov 0  }
  0x25   :  { %v46_v3 = vld [vmem:[#allocation3 + $0x18] sm:$0xff]   ;;  %v47_v4 = vld [vmem:[#allocation3 + $0x20] sm:$0xff]   ;;  %v48_v5 = vld [vmem:[#allocation3 + $0x28] sm:$0xff]  }
  0x26   :  { %v49_v6 = vld [vmem:[#allocation3 + $0x30] sm:$0xff]   ;;  %v50_v7 = vld [vmem:[#allocation3 + $0x38] sm:$0xff]   ;;  %v51_v8 = vld [vmem:[#allocation3 + $0x40] sm:$0xff]  }
  0x27   :  { %v52_v9 = vld [vmem:[#allocation3 + $0x48] sm:$0xff]   ;;  %v53_v10 = vld [vmem:[#allocation3 + $0x50] sm:$0xff]   ;;  %v54_v11 = vld [vmem:[#allocation3 + $0x58] sm:$0xff]  }
  0x28   :  { %v55_v12 = vld [vmem:[#allocation3 + $0x60] sm:$0xff]   ;;  %v56_v13 = vld [vmem:[#allocation3 + $0x68] sm:$0xff]   ;;  %v57_v14 = vld [vmem:[#allocation3 + $0x70] sm:$0xff]  }
  0x29   :  { %v58_v15 = vld [vmem:[#allocation3 + $0x78] sm:$0xff]  }
  0x2a LB: > { %v81_v16 = vadd.f32 %v2434_v2, %v2442_v0  ;;  %v88_v17 = vadd.f32 %v2430_v3, %v2438_v1  ;;  %s1151_s0 = sadd.s32 5, %s2446_s0   ;;  %s2446_s0 = sphi %s2523_s0, %s1151_s0   ;;  %v2442_v0 = vphi %v43_v0, %v3434_v0   ;;  %v2438_v1 = vphi %v44_v1, %v3433_v1   ;;  %v2434_v2 = vphi %v45_v2, %v3432_v2   ;;  %v2430_v3 = vphi %v46_v3, %v3431_v3   ;;  %v2426_v4 = vphi %v47_v4, %v3430_v4   ;;  %v2422_v5 = vphi %v48_v5, %v3429_v5   ;;  %v2418_v6 = vphi %v49_v6, %v3428_v6   ;;  %v2414_v7 = vphi %v50_v7, %v3427_v7   ;;  %v2410_v8 = vphi %v51_v8, %v3426_v8   ;;  %v2406_v9 = vphi %v52_v9, %v3425_v9   ;;  %v2402_v10 = vphi %v53_v10, %v3424_v10   ;;  %v2398_v11 = vphi %v54_v11, %v3423_v11   ;;  %v2394_v12 = vphi %v55_v12, %v3422_v12   ;;  %v2390_v13 = vphi %v56_v13, %v3421_v13   ;;  %v2386_v14 = vphi %v57_v14, %v3420_v14   ;;  %v2382_v15 = vphi %v58_v15, %v3419_v15  }
  0x2b   : > { %p1180_p13 = scmp.lt.s32.totalorder %s1151_s0, 100 }
  0x2c   : > { %v82_v18 = vadd.f32 %v2426_v4, %v81_v16  ;;  %v89_v19 = vadd.f32 %v2422_v5, %v88_v17 }
  0x2e   : > { %v83_v20 = vadd.f32 %v2418_v6, %v82_v18  ;;  %v90_v21 = vadd.f32 %v2414_v7, %v89_v19 }
  0x30   : > { %v84_v22 = vadd.f32 %v2410_v8, %v83_v20  ;;  %v91_v23 = vadd.f32 %v2406_v9, %v90_v21 }
  0x32   : > { %v85_v24 = vadd.f32 %v2402_v10, %v84_v22  ;;  %v92_v25 = vadd.f32 %v2398_v11, %v91_v23 }
  0x34   : > { %v86_v26 = vadd.f32 %v2394_v12, %v85_v24  ;;  %v93_v27 = vadd.f32 %v2390_v13, %v92_v25 }
  0x36   : > { %v87_v28 = vadd.f32 %v2386_v14, %v86_v26  ;;  %v94_v29 = vadd.f32 %v2382_v15, %v93_v27 }
  0x38   : > { %2070 = vrcp.f32 %v87_v28 }
  0x39   : > { %2072 = vrcp.f32 %v94_v29 }
  0x42   : > { %v2071_v30 = vpop.eup %2070 }
  0x43   : > { %v2073_v31 = vpop.eup %2072  ;;  %v97_v32 = vmul.f32 %v2071_v30, %v87_v28 }
  0x44   : > { %v98_v33 = vmul.f32 %v2073_v31, %v94_v29 }
  0x45   : > { %v99_v34 = vsub.f32 2.0, %v97_v32 }
  0x46   : > { %v100_v35 = vsub.f32 2.0, %v98_v33 }
  0x47   : > { %v101_v36 = vmul.f32 %v2071_v30, %v99_v34 }
  0x48   : > { %v102_v37 = vmul.f32 %v2073_v31, %v100_v35 }
  0x49   : > { %v2559_v38 = vmul.f32 %v2442_v0, %v101_v36  ;;  %v2563_v40 = vmul.f32 %v2434_v2, %v101_v36  ;;  %v2567_v42 = vmul.f32 %v2426_v4, %v101_v36  ;;  %v2571_v44 = vmul.f32 %v2418_v6, %v101_v36 }
  0x4a   : > { %v2561_v39 = vmul.f32 %v2438_v1, %v102_v37  ;;  %v2565_v41 = vmul.f32 %v2430_v3, %v102_v37  ;;  %v2569_v43 = vmul.f32 %v2422_v5, %v102_v37  ;;  %v2576_v48 = vmul.f32 %v2414_v7, %v102_v37 }
  0x4b   : > { %v119_v45 = vrot.slane %v2559_v38, 4  ;;  %v131_v47 = vrot.slane %v2563_v40, 4  ;;  %v143_v51 = vrot.slane %v2567_v42, 4  ;;  %v155_v53 = vrot.slane %v2571_v44, 4 }
  0x4c   : > { %v125_v46 = vrot.slane %v2561_v39, 4  ;;  %v137_v49 = vrot.slane %v2565_v41, 4  ;;  %v149_v52 = vrot.slane %v2569_v43, 4  ;;  %v161_v57 = vrot.slane %v2576_v48, 4 }
  0x4d   : > { %v120_v50 = vadd.f32 %v119_v45, %v2559_v38  ;;  %v132_v55 = vadd.f32 %v131_v47, %v2563_v40  ;;  %v144_v59 = vadd.f32 %v143_v51, %v2567_v42  ;;  %v156_v61 = vadd.f32 %v155_v53, %v2571_v44 }
  0x4e   : > { %v126_v54 = vadd.f32 %v125_v46, %v2561_v39  ;;  %v138_v56 = vadd.f32 %v137_v49, %v2565_v41  ;;  %v150_v60 = vadd.f32 %v149_v52, %v2569_v43  ;;  %v2590_v62 = vmul.f32 %v2410_v8, %v101_v36 }
  0x4f   : > { %v121_v58 = vrot.slane %v120_v50, 2  ;;  %v2592_v63 = vmul.f32 %v2406_v9, %v102_v37  ;;  %v2594_v0 = vmul.f32 %v2402_v10, %v101_v36  ;;  %v2597_v1 = vmul.f32 %v2398_v11, %v102_v37 }
  0x50   : > { %v2600_v2 = vmul.f32 %v2394_v12, %v101_v36  ;;  %v2603_v3 = vmul.f32 %v2390_v13, %v102_v37  ;;  %v127_v4 = vrot.slane %v126_v54, 2  ;;  %v133_v5 = vrot.slane %v132_v55, 2 }
  0x51   : > { %v2606_v6 = vmul.f32 %v2386_v14, %v101_v36  ;;  %v2609_v7 = vmul.f32 %v2382_v15, %v102_v37  ;;  %v139_v8 = vrot.slane %v138_v56, 2  ;;  %v162_v9 = vadd.f32 %v161_v57, %v2576_v48 }
  0x52   : > { %v122_v10 = vadd.f32 %v121_v58, %v120_v50  ;;  %v145_v11 = vrot.slane %v144_v59, 2  ;;  %v151_v16 = vrot.slane %v150_v60, 2  ;;  %v157_v17 = vrot.slane %v156_v61, 2 }
  0x53   : > { %v167_v12 = vrot.slane %v2590_v62, 4  ;;  %v173_v13 = vrot.slane %v2592_v63, 4  ;;  %v179_v18 = vrot.slane %v2594_v0, 4  ;;  %v185_v19 = vrot.slane %v2597_v1, 4 }
  0x54   : > { %v128_v14 = vadd.f32 %v127_v4, %v126_v54  ;;  %v134_v20 = vadd.f32 %v133_v5, %v132_v55  ;;  %v191_v15 = vrot.slane %v2600_v2, 4  ;;  %v197_v21 = vrot.slane %v2603_v3, 4 }
  0x55   : > { %v168_v22 = vadd.f32 %v167_v12, %v2590_v62  ;;  %v174_v23 = vadd.f32 %v173_v13, %v2592_v63  ;;  %v180_v24 = vadd.f32 %v179_v18, %v2594_v0  ;;  %v203_v25 = vrot.slane %v2606_v6, 4 }
  0x56   : > { %v140_v26 = vadd.f32 %v139_v8, %v138_v56  ;;  %v163_v27 = vrot.slane %v162_v9, 2  ;;  %v186_v28 = vadd.f32 %v185_v19, %v2597_v1  ;;  %v209_v29 = vrot.slane %v2609_v7, 4 }
  0x57   : > { %v123_v30 = vrot.slane %v122_v10, 1  ;;  %v146_v31 = vadd.f32 %v145_v11, %v144_v59  ;;  %v169_v32 = vrot.slane %v168_v22, 2  ;;  %v192_v33 = vadd.f32 %v191_v15, %v2600_v2 }
  0x58   : > { %v129_v34 = vrot.slane %v128_v14, 1  ;;  %v152_v35 = vadd.f32 %v151_v16, %v150_v60  ;;  %v175_v36 = vrot.slane %v174_v23, 2  ;;  %v198_v37 = vadd.f32 %v197_v21, %v2603_v3 }
  0x59   : > { %v135_v45 = vrot.slane %v134_v20, 1  ;;  %v158_v46 = vadd.f32 %v157_v17, %v156_v61  ;;  %v181_v47 = vrot.slane %v180_v24, 2  ;;  %v204_v49 = vadd.f32 %v203_v25, %v2606_v6 }
  0x5a   : > { %v141_v50 = vrot.slane %v140_v26, 1  ;;  %v164_v51 = vadd.f32 %v163_v27, %v162_v9  ;;  %v187_v52 = vrot.slane %v186_v28, 2  ;;  %v210_v53 = vadd.f32 %v209_v29, %v2609_v7 }
  0x5b   : > { %v124_v54 = vadd.f32 %v123_v30, %v122_v10  ;;  %v147_v55 = vrot.slane %v146_v31, 1  ;;  %v170_v56 = vadd.f32 %v169_v32, %v168_v22  ;;  %v193_v57 = vrot.slane %v192_v33, 2 }
  0x5c   : > { %v130_v58 = vadd.f32 %v129_v34, %v128_v14  ;;  %v153_v59 = vrot.slane %v152_v35, 1  ;;  %v176_v60 = vadd.f32 %v175_v36, %v174_v23  ;;  %v199_v4 = vrot.slane %v198_v37, 2 }
  0x5d   : > { %v136_v5 = vadd.f32 %v135_v45, %v134_v20  ;;  %v159_v8 = vrot.slane %v158_v46, 1  ;;  %v182_v11 = vadd.f32 %v181_v47, %v180_v24  ;;  %v205_v61 = vrot.slane %v204_v49, 2 }
  0x5e   : > { %v142_v16 = vadd.f32 %v141_v50, %v140_v26  ;;  %v165_v17 = vrot.slane %v164_v51, 1  ;;  %v188_v12 = vadd.f32 %v187_v52, %v186_v28  ;;  %v211_v13 = vrot.slane %v210_v53, 2 }
  0x5f   : > { %v148_v9 = vadd.f32 %v147_v55, %v146_v31  ;;  %v171_v18 = vrot.slane %v170_v56, 1  ;;  %v194_v19 = vadd.f32 %v193_v57, %v192_v33  ;;  %2074 = vrcp.f32 %v124_v54 }
  0x60   : > { %v154_v10 = vadd.f32 %v153_v59, %v152_v35  ;;  %v177_v15 = vrot.slane %v176_v60, 1  ;;  %v200_v21 = vadd.f32 %v199_v4, %v198_v37  ;;  %2076 = vrcp.f32 %v130_v58 }
  0x61   : > { %v160_v14 = vadd.f32 %v159_v8, %v158_v46  ;;  %v183_v22 = vrot.slane %v182_v11, 1  ;;  %v206_v23 = vadd.f32 %v205_v61, %v204_v49  ;;  %2078 = vrcp.f32 %v136_v5 }
  0x62   : > { %v166_v20 = vadd.f32 %v165_v17, %v164_v51  ;;  %v189_v25 = vrot.slane %v188_v12, 1  ;;  %v212_v24 = vadd.f32 %v211_v13, %v210_v53  ;;  %2080 = vrcp.f32 %v142_v16 }
  0x63   : > { %v172_v26 = vadd.f32 %v171_v18, %v170_v56  ;;  %v195_v27 = vrot.slane %v194_v19, 1  ;;  %2082 = vrcp.f32 %v148_v9  ;;  %v178_v28 = vadd.f32 %v177_v15, %v176_v60 }
  0x64   : > { %v201_v29 = vrot.slane %v200_v21, 1  ;;  %2084 = vrcp.f32 %v154_v10  ;;  %v184_v30 = vadd.f32 %v183_v22, %v182_v11  ;;  %v207_v31 = vrot.slane %v206_v23, 1 }
  0x65   : > { %2086 = vrcp.f32 %v160_v14  ;;  %v190_v32 = vadd.f32 %v189_v25, %v188_v12  ;;  %v213_v33 = vrot.slane %v212_v24, 1  ;;  %v196_v34 = vadd.f32 %v195_v27, %v194_v19 }
  0x66   : > { %2088 = vrcp.f32 %v166_v20  ;;  %v202_v35 = vadd.f32 %v201_v29, %v200_v21  ;;  %v208_v37 = vadd.f32 %v207_v31, %v206_v23 }
  0x67   : > { %2090 = vrcp.f32 %v172_v26  ;;  %v214_v46 = vadd.f32 %v213_v33, %v212_v24 }
  0x68   : > { %2092 = vrcp.f32 %v178_v28 }
  0x69   : > { %v2075_v36 = vpop.eup %2074  ;;  %2094 = vrcp.f32 %v184_v30 }
  0x6a   : > { %v2077_v45 = vpop.eup %2076  ;;  %2096 = vrcp.f32 %v190_v32  ;;  %v231_v47 = vmul.f32 %v2075_v36, %v124_v54 }
  0x6b   : > { %v2079_v49 = vpop.eup %2078  ;;  %2098 = vrcp.f32 %v196_v34  ;;  %v232_v50 = vmul.f32 %v2077_v45, %v130_v58 }
  0x6c   : > { %v2081_v51 = vpop.eup %2080  ;;  %2100 = vrcp.f32 %v202_v35  ;;  %v233_v52 = vmul.f32 %v2079_v49, %v136_v5  ;;  %v247_v53 = vsub.f32 2.0, %v231_v47 }
  0x6d   : > { %v2083_v55 = vpop.eup %2082  ;;  %2102 = vrcp.f32 %v208_v37  ;;  %v234_v56 = vmul.f32 %v2081_v51, %v142_v16  ;;  %v248_v57 = vsub.f32 2.0, %v232_v50 }
  0x6e   : > { %v2085_v59 = vpop.eup %2084  ;;  %2104 = vrcp.f32 %v214_v46  ;;  %v235_v60 = vmul.f32 %v2083_v55, %v148_v9  ;;  %v249_v4 = vsub.f32 2.0, %v233_v52  ;;  %v263_v13 = vmul.f32 %v2075_v36, %v247_v53 }
  0x6f   : > { %v2087_v8 = vpop.eup %2086  ;;  %v236_v11 = vmul.f32 %v2085_v59, %v154_v10  ;;  %v250_v61 = vsub.f32 2.0, %v234_v56  ;;  %v264_v5 = vmul.f32 %v2077_v45, %v248_v57 }
  0x70   : > { %v2089_v17 = vpop.eup %2088  ;;  %v237_v54 = vmul.f32 %v2087_v8, %v160_v14  ;;  %v251_v12 = vsub.f32 2.0, %v235_v60  ;;  %v265_v16 = vmul.f32 %v2079_v49, %v249_v4  ;;  %v2629_v14 = vmul.f32 %v263_v13, %v2559_v38 }
  0x71   : > { %v2091_v58 = vpop.eup %2090  ;;  %v238_v18 = vmul.f32 %v2089_v17, %v166_v20  ;;  %v252_v19 = vsub.f32 2.0, %v236_v11  ;;  %v266_v9 = vmul.f32 %v2081_v51, %v250_v61  ;;  %v2632_v45 = vmul.f32 %v264_v5, %v2561_v39 }
  0x72   : > { %v2093_v15 = vpop.eup %2092  ;;  %v239_v21 = vmul.f32 %v2091_v58, %v172_v26  ;;  %v253_v22 = vsub.f32 2.0, %v237_v54  ;;  %v267_v31 = vmul.f32 %v2083_v55, %v251_v12  ;;  %v281_v51 = vmul.f32 %v265_v16, %v2563_v40 }
  0x73   : > { %v2095_v23 = vpop.eup %2094  ;;  %v240_v25 = vmul.f32 %v2093_v15, %v178_v28  ;;  %v254_v24 = vsub.f32 2.0, %v238_v18  ;;  %v268_v47 = vmul.f32 %v2085_v59, %v252_v19  ;;  %v282_v38 = vmul.f32 %v266_v9, %v2565_v41 }
  0x74   : > { %v2097_v27 = vpop.eup %2096  ;;  %v241_v29 = vmul.f32 %v2095_v23, %v184_v30  ;;  %v255_v10 = vsub.f32 2.0, %v239_v21  ;;  %v269_v28 = vmul.f32 %v2087_v8, %v253_v22  ;;  %v283_v59 = vmul.f32 %v267_v31, %v2567_v42 }
  0x75   : > { %v2099_v33 = vpop.eup %2098  ;;  %v242_v36 = vmul.f32 %v2097_v27, %v190_v32  ;;  %v256_v20 = vsub.f32 2.0, %v240_v25  ;;  %v270_v55 = vmul.f32 %v2089_v17, %v254_v24 }
  0x76   : > { %v2101_v26 = vpop.eup %2100  ;;  %v243_v49 = vmul.f32 %v2099_v33, %v196_v34  ;;  %v257_v50 = vsub.f32 2.0, %v241_v29  ;;  %v271_v60 = vmul.f32 %v2091_v58, %v255_v10  ;;  %v284_v34 = vmul.f32 %v268_v47, %v2569_v43 }
  0x77   : > { %v2103_v52 = vpop.eup %2102  ;;  %v244_v30 = vmul.f32 %v2101_v26, %v202_v35  ;;  %v258_v53 = vsub.f32 2.0, %v242_v36  ;;  %v272_v11 = vmul.f32 %v2093_v15, %v256_v20  ;;  %v285_v40 = vmul.f32 %v269_v28, %v2571_v44 }
  0x78   : > { %v2105_v56 = vpop.eup %2104  ;;  %v245_v57 = vmul.f32 %v2103_v52, %v208_v37  ;;  %v259_v32 = vsub.f32 2.0, %v243_v49  ;;  %v273_v61 = vmul.f32 %v2095_v23, %v257_v50  ;;  %v295_v35 = vadd.f32 %v281_v51, %v2629_v14 }
  0x79   : > { %v246_v39 = vmul.f32 %v2105_v56, %v214_v46  ;;  %v260_v4 = vsub.f32 2.0, %v244_v30  ;;  %v274_v54 = vmul.f32 %v2097_v27, %v258_v53  ;;  %v286_v41 = vmul.f32 %v270_v55, %v2576_v48 }
  0x7a   : > { %v261_v8 = vsub.f32 2.0, %v245_v57  ;;  %v302_v37 = vadd.f32 %v282_v38, %v2632_v45  ;;  %v275_v12 = vmul.f32 %v2099_v33, %v259_v32  ;;  %v287_v42 = vmul.f32 %v271_v60, %v2590_v62 }
  0x7b   : > { %v262_v17 = vsub.f32 2.0, %v246_v39  ;;  %v296_v46 = vadd.f32 %v295_v35, %v283_v59  ;;  %v276_v13 = vmul.f32 %v2101_v26, %v260_v4  ;;  %v288_v58 = vmul.f32 %v272_v11, %v2592_v63 }
  0x7c   : > { %v303_v43 = vadd.f32 %v302_v37, %v284_v34  ;;  %v277_v18 = vmul.f32 %v2103_v52, %v261_v8  ;;  %v289_v19 = vmul.f32 %v273_v61, %v2594_v0  ;;  %v290_v15 = vmul.f32 %v274_v54, %v2597_v1 }
  0x7d   : > { %v297_v44 = vadd.f32 %v296_v46, %v285_v40  ;;  %v278_v5 = vmul.f32 %v2105_v56, %v262_v17  ;;  %v291_v48 = vmul.f32 %v275_v12, %v2600_v2  ;;  %v292_v16 = vmul.f32 %v276_v13, %v2603_v3 }
  0x7e   : > { %v304_v21 = vadd.f32 %v303_v43, %v286_v41  ;;  %v293_v62 = vmul.f32 %v277_v18, %v2606_v6 }
  0x7f   : > { %v298_v22 = vadd.f32 %v297_v44, %v287_v42  ;;  %v294_v63 = vmul.f32 %v278_v5, %v2609_v7 }
  0x80   : > { %v305_v23 = vadd.f32 %v304_v21, %v288_v58 }
  0x81   : > { %v299_v25 = vadd.f32 %v298_v22, %v289_v19 }
  0x82   : > { %v306_v24 = vadd.f32 %v305_v23, %v290_v15 }
  0x83   : > { %v300_v9 = vadd.f32 %v299_v25, %v291_v48 }
  0x84   : > { %v307_v27 = vadd.f32 %v306_v24, %v292_v16 }
  0x85   : > { %v301_v0 = vadd.f32 %v300_v9, %v293_v62 }
  0x86   : > { %v308_v29 = vadd.f32 %v307_v27, %v294_v63 }
  0x87   : > { %2106 = vrcp.f32 %v301_v0 }
  0x88   : > { %2108 = vrcp.f32 %v308_v29 }
  0x91   : > { %v2107_v1 = vpop.eup %2106 }
  0x92   : > { %v2109_v10 = vpop.eup %2108  ;;  %v311_v31 = vmul.f32 %v2107_v1, %v301_v0 }
  0x93   : > { %v312_v2 = vmul.f32 %v2109_v10, %v308_v29 }
  0x94   : > { %v313_v33 = vsub.f32 2.0, %v311_v31 }
  0x95   : > { %v314_v36 = vsub.f32 2.0, %v312_v2 }
  0x96   : > { %v315_v3 = vmul.f32 %v2107_v1, %v313_v33 }
  0x97   : > { %v316_v20 = vmul.f32 %v2109_v10, %v314_v36 }
  0x98   : > { %v2651_v6 = vmul.f32 %v315_v3, %v2629_v14  ;;  %v2656_v47 = vmul.f32 %v315_v3, %v281_v51  ;;  %v2660_v49 = vmul.f32 %v315_v3, %v283_v59  ;;  %v2664_v28 = vmul.f32 %v315_v3, %v285_v40 }
  0x99   : > { %v2654_v7 = vmul.f32 %v316_v20, %v2632_v45  ;;  %v2658_v26 = vmul.f32 %v316_v20, %v282_v38  ;;  %v2662_v50 = vmul.f32 %v316_v20, %v284_v34  ;;  %v2669_v53 = vmul.f32 %v316_v20, %v286_v41 }
  0x9a   : > { %v333_v52 = vrot.slane %v2651_v6, 4  ;;  %v345_v14 = vrot.slane %v2656_v47, 4  ;;  %v357_v55 = vrot.slane %v2660_v49, 4  ;;  %v369_v56 = vrot.slane %v2664_v28, 4 }
  0x9b   : > { %v339_v30 = vrot.slane %v2654_v7, 4  ;;  %v351_v45 = vrot.slane %v2658_v26, 4  ;;  %v363_v38 = vrot.slane %v2662_v50, 4  ;;  %v375_v59 = vrot.slane %v2669_v53, 4 }
  0x9c   : > { %v334_v51 = vadd.f32 %v333_v52, %v2651_v6  ;;  %v346_v32 = vadd.f32 %v345_v14, %v2656_v47  ;;  %v358_v4 = vadd.f32 %v357_v55, %v2660_v49  ;;  %v370_v34 = vadd.f32 %v369_v56, %v2664_v28 }
  0x9d   : > { %v340_v57 = vadd.f32 %v339_v30, %v2654_v7  ;;  %v352_v60 = vadd.f32 %v351_v45, %v2658_v26  ;;  %v364_v11 = vadd.f32 %v363_v38, %v2662_v50  ;;  %v2683_v8 = vmul.f32 %v315_v3, %v287_v42 }
  0x9e   : > { %v335_v39 = vrot.slane %v334_v51, 2  ;;  %v2685_v61 = vmul.f32 %v316_v20, %v288_v58  ;;  %v2687_v40 = vmul.f32 %v315_v3, %v289_v19  ;;  %v2689_v35 = vmul.f32 %v316_v20, %v290_v15 }
  0x9f   : > { %v2691_v17 = vmul.f32 %v315_v3, %v291_v48  ;;  %v2693_v54 = vmul.f32 %v316_v20, %v292_v16  ;;  %v341_v41 = vrot.slane %v340_v57, 2  ;;  %v347_v37 = vrot.slane %v346_v32, 2 }
  0xa0   : > { %v2695_v12 = vmul.f32 %v315_v3, %v293_v62  ;;  %v2697_v46 = vmul.f32 %v316_v20, %v294_v63  ;;  %v353_v13 = vrot.slane %v352_v60, 2  ;;  %v376_v42 = vadd.f32 %v375_v59, %v2669_v53 }
  0xa1   : > { %v336_v43 = vadd.f32 %v335_v39, %v334_v51  ;;  %v359_v58 = vrot.slane %v358_v4, 2  ;;  %v365_v18 = vrot.slane %v364_v11, 2  ;;  %v371_v19 = vrot.slane %v370_v34, 2 }
  0xa2   : > { %v381_v44 = vrot.slane %v2683_v8, 4  ;;  %v387_v5 = vrot.slane %v2685_v61, 4  ;;  %v393_v15 = vrot.slane %v2687_v40, 4  ;;  %v399_v21 = vrot.slane %v2689_v35, 4 }
  0xa3   : > { %v342_v48 = vadd.f32 %v341_v41, %v340_v57  ;;  %v348_v22 = vadd.f32 %v347_v37, %v346_v32  ;;  %v405_v16 = vrot.slane %v2691_v17, 4  ;;  %v411_v23 = vrot.slane %v2693_v54, 4 }
  0xa4   : > { %v382_v62 = vadd.f32 %v381_v44, %v2683_v8  ;;  %v388_v25 = vadd.f32 %v387_v5, %v2685_v61  ;;  %v394_v63 = vadd.f32 %v393_v15, %v2687_v40  ;;  %v417_v24 = vrot.slane %v2695_v12, 4 }
  0xa5   : > { %v354_v9 = vadd.f32 %v353_v13, %v352_v60  ;;  %v377_v27 = vrot.slane %v376_v42, 2  ;;  %v400_v0 = vadd.f32 %v399_v21, %v2689_v35  ;;  %v423_v29 = vrot.slane %v2697_v46, 4 }
  0xa6   : > { %v337_v1 = vrot.slane %v336_v43, 1  ;;  %v360_v10 = vadd.f32 %v359_v58, %v358_v4  ;;  %v383_v31 = vrot.slane %v382_v62, 2  ;;  %v406_v2 = vadd.f32 %v405_v16, %v2691_v17 }
  0xa7   : > { %v343_v33 = vrot.slane %v342_v48, 1  ;;  %v366_v36 = vadd.f32 %v365_v18, %v364_v11  ;;  %v389_v3 = vrot.slane %v388_v25, 2  ;;  %v412_v20 = vadd.f32 %v411_v23, %v2693_v54 }
  0xa8   : > { %v349_v52 = vrot.slane %v348_v22, 1  ;;  %v372_v30 = vadd.f32 %v371_v19, %v370_v34  ;;  %v395_v14 = vrot.slane %v394_v63, 2  ;;  %v418_v45 = vadd.f32 %v417_v24, %v2695_v12 }
  0xa9   : > { %v355_v51 = vrot.slane %v354_v9, 1  ;;  %v378_v55 = vadd.f32 %v377_v27, %v376_v42  ;;  %v401_v38 = vrot.slane %v400_v0, 2  ;;  %v424_v56 = vadd.f32 %v423_v29, %v2697_v46 }
  0xaa   : > { %v338_v57 = vadd.f32 %v337_v1, %v336_v43  ;;  %v361_v32 = vrot.slane %v360_v10, 1  ;;  %v384_v60 = vadd.f32 %v383_v31, %v382_v62  ;;  %v407_v59 = vrot.slane %v406_v2, 2 }
  0xab   : > { %v344_v39 = vadd.f32 %v343_v33, %v342_v48  ;;  %v367_v4 = vrot.slane %v366_v36, 1  ;;  %v390_v11 = vadd.f32 %v389_v3, %v388_v25  ;;  %v413_v41 = vrot.slane %v412_v20, 2 }
  0xac   : > { %v350_v37 = vadd.f32 %v349_v52, %v348_v22  ;;  %v373_v13 = vrot.slane %v372_v30, 1  ;;  %v396_v58 = vadd.f32 %v395_v14, %v394_v63  ;;  %v419_v34 = vrot.slane %v418_v45, 2 }
  0xad   : > { %v356_v18 = vadd.f32 %v355_v51, %v354_v9  ;;  %v379_v19 = vrot.slane %v378_v55, 1  ;;  %v402_v44 = vadd.f32 %v401_v38, %v400_v0  ;;  %v425_v5 = vrot.slane %v424_v56, 2 }
  0xae   : > { %v362_v42 = vadd.f32 %v361_v32, %v360_v10  ;;  %v385_v15 = vrot.slane %v384_v60, 1  ;;  %v408_v21 = vadd.f32 %v407_v59, %v406_v2  ;;  %2110 = vrcp.f32 %v338_v57 }
  0xaf   : > { %v368_v43 = vadd.f32 %v367_v4, %v366_v36  ;;  %v391_v16 = vrot.slane %v390_v11, 1  ;;  %v414_v23 = vadd.f32 %v413_v41, %v412_v20  ;;  %2112 = vrcp.f32 %v344_v39 }
  0xb0   : > { %v374_v48 = vadd.f32 %v373_v13, %v372_v30  ;;  %v397_v62 = vrot.slane %v396_v58, 1  ;;  %v420_v25 = vadd.f32 %v419_v34, %v418_v45  ;;  %2114 = vrcp.f32 %v350_v37 }
  0xb1   : > { %v380_v22 = vadd.f32 %v379_v19, %v378_v55  ;;  %v403_v24 = vrot.slane %v402_v44, 1  ;;  %v426_v63 = vadd.f32 %v425_v5, %v424_v56  ;;  %2116 = vrcp.f32 %v356_v18 }
  0xb2   : > { %v386_v9 = vadd.f32 %v385_v15, %v384_v60  ;;  %v409_v27 = vrot.slane %v408_v21, 1  ;;  %2118 = vrcp.f32 %v362_v42  ;;  %v392_v0 = vadd.f32 %v391_v16, %v390_v11 }
  0xb3   : > { %v415_v29 = vrot.slane %v414_v23, 1  ;;  %2120 = vrcp.f32 %v368_v43  ;;  %v398_v1 = vadd.f32 %v397_v62, %v396_v58  ;;  %v421_v10 = vrot.slane %v420_v25, 1 }
  0xb4   : > { %2122 = vrcp.f32 %v374_v48  ;;  %v404_v31 = vadd.f32 %v403_v24, %v402_v44  ;;  %v427_v2 = vrot.slane %v426_v63, 1  ;;  %v410_v33 = vadd.f32 %v409_v27, %v408_v21 }
  0xb5   : > { %2124 = vrcp.f32 %v380_v22  ;;  %v416_v36 = vadd.f32 %v415_v29, %v414_v23  ;;  %v422_v20 = vadd.f32 %v421_v10, %v420_v25 }
  0xb6   : > { %2126 = vrcp.f32 %v386_v9  ;;  %v428_v30 = vadd.f32 %v427_v2, %v426_v63 }
  0xb7   : > { %2128 = vrcp.f32 %v392_v0 }
  0xb8   : > { %v2111_v3 = vpop.eup %2110  ;;  %2130 = vrcp.f32 %v398_v1 }
  0xb9   : > { %v2113_v52 = vpop.eup %2112  ;;  %2132 = vrcp.f32 %v404_v31  ;;  %v445_v14 = vmul.f32 %v2111_v3, %v338_v57 }
  0xba   : > { %v2115_v45 = vpop.eup %2114  ;;  %2134 = vrcp.f32 %v410_v33  ;;  %v446_v51 = vmul.f32 %v2113_v52, %v344_v39 }
  0xbb   : > { %v2117_v55 = vpop.eup %2116  ;;  %2136 = vrcp.f32 %v416_v36  ;;  %v447_v38 = vmul.f32 %v2115_v45, %v350_v37  ;;  %v461_v56 = vsub.f32 2.0, %v445_v14 }
  0xbc   : > { %v2119_v32 = vpop.eup %2118  ;;  %2138 = vrcp.f32 %v422_v20  ;;  %v448_v60 = vmul.f32 %v2117_v55, %v356_v18  ;;  %v462_v59 = vsub.f32 2.0, %v446_v51 }
  0xbd   : > { %v2121_v4 = vpop.eup %2120  ;;  %2140 = vrcp.f32 %v428_v30  ;;  %v449_v11 = vmul.f32 %v2119_v32, %v362_v42  ;;  %v463_v41 = vsub.f32 2.0, %v447_v38  ;;  %v477_v5 = vmul.f32 %v2111_v3, %v461_v56 }
  0xbe   : > { %v2123_v13 = vpop.eup %2122  ;;  %v450_v58 = vmul.f32 %v2121_v4, %v368_v43  ;;  %v464_v34 = vsub.f32 2.0, %v448_v60  ;;  %v478_v37 = vmul.f32 %v2113_v52, %v462_v59 }
  0xbf   : > { %v2125_v19 = vpop.eup %2124  ;;  %v451_v57 = vmul.f32 %v2123_v13, %v374_v48  ;;  %v465_v44 = vsub.f32 2.0, %v449_v11  ;;  %v479_v18 = vmul.f32 %v2115_v45, %v463_v41  ;;  %v2717_v48 = vmul.f32 %v477_v5, %v2651_v6 }
  0xc0   : > { %v2127_v39 = vpop.eup %2126  ;;  %v452_v15 = vmul.f32 %v2125_v19, %v380_v22  ;;  %v466_v21 = vsub.f32 2.0, %v450_v58  ;;  %v480_v42 = vmul.f32 %v2117_v55, %v464_v34  ;;  %v2720_v52 = vmul.f32 %v478_v37, %v2654_v7 }
  0xc1   : > { %v2129_v16 = vpop.eup %2128  ;;  %v453_v23 = vmul.f32 %v2127_v39, %v386_v9  ;;  %v467_v62 = vsub.f32 2.0, %v451_v57  ;;  %v481_v10 = vmul.f32 %v2119_v32, %v465_v44  ;;  %v495_v55 = vmul.f32 %v479_v18, %v2656_v47 }
  0xc2   : > { %v2131_v25 = vpop.eup %2130  ;;  %v454_v24 = vmul.f32 %v2129_v16, %v392_v0  ;;  %v468_v63 = vsub.f32 2.0, %v452_v15  ;;  %v482_v14 = vmul.f32 %v2121_v4, %v466_v21  ;;  %v496_v6 = vmul.f32 %v480_v42, %v2658_v26 }
  0xc3   : > { %v2133_v27 = vpop.eup %2132  ;;  %v455_v29 = vmul.f32 %v2131_v25, %v398_v1  ;;  %v469_v43 = vsub.f32 2.0, %v453_v23  ;;  %v483_v0 = vmul.f32 %v2123_v13, %v467_v62  ;;  %v497_v4 = vmul.f32 %v481_v10, %v2660_v49 }
  0xc4   : > { %v2135_v2 = vpop.eup %2134  ;;  %v456_v3 = vmul.f32 %v2133_v27, %v404_v31  ;;  %v470_v22 = vsub.f32 2.0, %v454_v24  ;;  %v484_v32 = vmul.f32 %v2125_v19, %v468_v63 }
  0xc5   : > { %v2137_v9 = vpop.eup %2136  ;;  %v457_v45 = vmul.f32 %v2135_v2, %v410_v33  ;;  %v471_v51 = vsub.f32 2.0, %v455_v29  ;;  %v485_v11 = vmul.f32 %v2127_v39, %v469_v43  ;;  %v498_v33 = vmul.f32 %v482_v14, %v2662_v50 }
  0xc6   : > { %v2139_v38 = vpop.eup %2138  ;;  %v458_v1 = vmul.f32 %v2137_v9, %v416_v36  ;;  %v472_v56 = vsub.f32 2.0, %v456_v3  ;;  %v486_v58 = vmul.f32 %v2129_v16, %v470_v22  ;;  %v499_v47 = vmul.f32 %v483_v0, %v2664_v28 }
  0xc7   : > { %v2141_v60 = vpop.eup %2140  ;;  %v459_v59 = vmul.f32 %v2139_v38, %v422_v20  ;;  %v473_v31 = vsub.f32 2.0, %v457_v45  ;;  %v487_v34 = vmul.f32 %v2131_v25, %v471_v51  ;;  %v509_v36 = vadd.f32 %v495_v55, %v2717_v48 }
  0xc8   : > { %v460_v7 = vmul.f32 %v2141_v60, %v428_v30  ;;  %v474_v41 = vsub.f32 2.0, %v458_v1  ;;  %v488_v57 = vmul.f32 %v2133_v27, %v472_v56  ;;  %v500_v26 = vmul.f32 %v484_v32, %v2669_v53 }
  0xc9   : > { %v475_v13 = vsub.f32 2.0, %v459_v59  ;;  %v516_v20 = vadd.f32 %v496_v6, %v2720_v52  ;;  %v489_v44 = vmul.f32 %v2135_v2, %v473_v31  ;;  %v501_v49 = vmul.f32 %v485_v11, %v2683_v8 }
  0xca   : > { %v476_v19 = vsub.f32 2.0, %v460_v7  ;;  %v510_v30 = vadd.f32 %v509_v36, %v497_v4  ;;  %v490_v5 = vmul.f32 %v2137_v9, %v474_v41  ;;  %v502_v39 = vmul.f32 %v486_v58, %v2685_v61 }
  0xcb   : > { %v517_v50 = vadd.f32 %v516_v20, %v498_v33  ;;  %v491_v15 = vmul.f32 %v2139_v38, %v475_v13  ;;  %v503_v21 = vmul.f32 %v487_v34, %v2687_v40  ;;  %v504_v16 = vmul.f32 %v488_v57, %v2689_v35 }
  0xcc   : > { %v511_v28 = vadd.f32 %v510_v30, %v499_v47  ;;  %v492_v37 = vmul.f32 %v2141_v60, %v476_v19  ;;  %v505_v53 = vmul.f32 %v489_v44, %v2691_v17  ;;  %v506_v18 = vmul.f32 %v490_v5, %v2693_v54 }
  0xcd   : > { %v518_v23 = vadd.f32 %v517_v50, %v500_v26  ;;  %v507_v8 = vmul.f32 %v491_v15, %v2695_v12 }
  0xce   : > { %v512_v62 = vadd.f32 %v511_v28, %v501_v49  ;;  %v508_v61 = vmul.f32 %v492_v37, %v2697_v46 }
  0xcf   : > { %v519_v25 = vadd.f32 %v518_v23, %v502_v39 }
  0xd0   : > { %v513_v24 = vadd.f32 %v512_v62, %v503_v21 }
  0xd1   : > { %v520_v63 = vadd.f32 %v519_v25, %v504_v16 }
  0xd2   : > { %v514_v42 = vadd.f32 %v513_v24, %v505_v53 }
  0xd3   : > { %v521_v27 = vadd.f32 %v520_v63, %v506_v18 }
  0xd4   : > { %v515_v40 = vadd.f32 %v514_v42, %v507_v8 }
  0xd5   : > { %v522_v29 = vadd.f32 %v521_v27, %v508_v61 }
  0xd6   : > { %2142 = vrcp.f32 %v515_v40 }
  0xd7   : > { %2144 = vrcp.f32 %v522_v29 }
  0xe0   : > { %v2143_v35 = vpop.eup %2142 }
  0xe1   : > { %v2145_v43 = vpop.eup %2144  ;;  %v525_v10 = vmul.f32 %v2143_v35, %v515_v40 }
  0xe2   : > { %v526_v17 = vmul.f32 %v2145_v43, %v522_v29 }
  0xe3   : > { %v527_v2 = vsub.f32 2.0, %v525_v10 }
  0xe4   : > { %v528_v3 = vsub.f32 2.0, %v526_v17 }
  0xe5   : > { %v529_v54 = vmul.f32 %v2143_v35, %v527_v2 }
  0xe6   : > { %v530_v22 = vmul.f32 %v2145_v43, %v528_v3 }
  0xe7   : > { %v2739_v12 = vmul.f32 %v529_v54, %v2717_v48  ;;  %v2744_v14 = vmul.f32 %v529_v54, %v495_v55  ;;  %v2748_v45 = vmul.f32 %v529_v54, %v497_v4  ;;  %v2752_v0 = vmul.f32 %v529_v54, %v499_v47 }
  0xe8   : > { %v2742_v46 = vmul.f32 %v530_v22, %v2720_v52  ;;  %v2746_v9 = vmul.f32 %v530_v22, %v496_v6  ;;  %v2750_v51 = vmul.f32 %v530_v22, %v498_v33  ;;  %v2757_v56 = vmul.f32 %v530_v22, %v500_v26 }
  0xe9   : > { %v547_v38 = vrot.slane %v2739_v12, 4  ;;  %v559_v48 = vrot.slane %v2744_v14, 4  ;;  %v571_v32 = vrot.slane %v2748_v45, 4  ;;  %v583_v60 = vrot.slane %v2752_v0, 4 }
  0xea   : > { %v553_v1 = vrot.slane %v2742_v46, 4  ;;  %v565_v52 = vrot.slane %v2746_v9, 4  ;;  %v577_v6 = vrot.slane %v2750_v51, 4  ;;  %v589_v4 = vrot.slane %v2757_v56, 4 }
  0xeb   : > { %v548_v55 = vadd.f32 %v547_v38, %v2739_v12  ;;  %v560_v31 = vadd.f32 %v559_v48, %v2744_v14  ;;  %v572_v41 = vadd.f32 %v571_v32, %v2748_v45  ;;  %v584_v33 = vadd.f32 %v583_v60, %v2752_v0 }
  0xec   : > { %v554_v59 = vadd.f32 %v553_v1, %v2742_v46  ;;  %v566_v11 = vadd.f32 %v565_v52, %v2746_v9  ;;  %v578_v58 = vadd.f32 %v577_v6, %v2750_v51  ;;  %v2771_v13 = vmul.f32 %v529_v54, %v501_v49 }
  0xed   : > { %v549_v7 = vrot.slane %v548_v55, 2  ;;  %v2773_v34 = vmul.f32 %v530_v22, %v502_v39  ;;  %v2775_v47 = vmul.f32 %v529_v54, %v503_v21  ;;  %v2777_v36 = vmul.f32 %v530_v22, %v504_v16 }
  0xee   : > { %v2779_v19 = vmul.f32 %v529_v54, %v505_v53  ;;  %v2781_v57 = vmul.f32 %v530_v22, %v506_v18  ;;  %v555_v26 = vrot.slane %v554_v59, 2  ;;  %v561_v20 = vrot.slane %v560_v31, 2 }
  0xef   : > { %v2783_v44 = vmul.f32 %v529_v54, %v507_v8  ;;  %v2785_v30 = vmul.f32 %v530_v22, %v508_v61  ;;  %v567_v5 = vrot.slane %v566_v11, 2  ;;  %v590_v49 = vadd.f32 %v589_v4, %v2757_v56 }
  0xf0   : > { %v550_v50 = vadd.f32 %v549_v7, %v548_v55  ;;  %v573_v39 = vrot.slane %v572_v41, 2  ;;  %v579_v15 = vrot.slane %v578_v58, 2  ;;  %v585_v21 = vrot.slane %v584_v33, 2 }
  0xf1   : > { %v595_v28 = vrot.slane %v2771_v13, 4  ;;  %v601_v37 = vrot.slane %v2773_v34, 4  ;;  %v607_v16 = vrot.slane %v2775_v47, 4  ;;  %v613_v23 = vrot.slane %v2777_v36, 4 }
  0xf2   : > { %v556_v53 = vadd.f32 %v555_v26, %v554_v59  ;;  %v562_v62 = vadd.f32 %v561_v20, %v560_v31  ;;  %v619_v18 = vrot.slane %v2779_v19, 4  ;;  %v625_v25 = vrot.slane %v2781_v57, 4 }
  0xf3   : > { %v596_v8 = vadd.f32 %v595_v28, %v2771_v13  ;;  %v602_v24 = vadd.f32 %v601_v37, %v2773_v34  ;;  %v608_v61 = vadd.f32 %v607_v16, %v2775_v47  ;;  %v631_v63 = vrot.slane %v2783_v44, 4 }
  0xf4   : > { %v568_v42 = vadd.f32 %v567_v5, %v566_v11  ;;  %v591_v27 = vrot.slane %v590_v49, 2  ;;  %v614_v40 = vadd.f32 %v613_v23, %v2777_v36  ;;  %v637_v29 = vrot.slane %v2785_v30, 4 }
  0xf5   : > { %v551_v35 = vrot.slane %v550_v50, 1  ;;  %v574_v43 = vadd.f32 %v573_v39, %v572_v41  ;;  %v597_v10 = vrot.slane %v596_v8, 2  ;;  %v620_v17 = vadd.f32 %v619_v18, %v2779_v19 }
  0xf6   : > { %v557_v2 = vrot.slane %v556_v53, 1  ;;  %v580_v3 = vadd.f32 %v579_v15, %v578_v58  ;;  %v603_v54 = vrot.slane %v602_v24, 2  ;;  %v626_v22 = vadd.f32 %v625_v25, %v2781_v57 }
  0xf7   : > { %v563_v38 = vrot.slane %v562_v62, 1  ;;  %v586_v1 = vadd.f32 %v585_v21, %v584_v33  ;;  %v609_v48 = vrot.slane %v608_v61, 2  ;;  %v632_v52 = vadd.f32 %v631_v63, %v2783_v44 }
  0xf8   : > { %v569_v55 = vrot.slane %v568_v42, 1  ;;  %v592_v32 = vadd.f32 %v591_v27, %v590_v49  ;;  %v615_v6 = vrot.slane %v614_v40, 2  ;;  %v638_v60 = vadd.f32 %v637_v29, %v2785_v30 }
  0xf9   : > { %v552_v59 = vadd.f32 %v551_v35, %v550_v50  ;;  %v575_v31 = vrot.slane %v574_v43, 1  ;;  %v598_v11 = vadd.f32 %v597_v10, %v596_v8  ;;  %v621_v4 = vrot.slane %v620_v17, 2 }
  0xfa   : > { %v558_v7 = vadd.f32 %v557_v2, %v556_v53  ;;  %v581_v41 = vrot.slane %v580_v3, 1  ;;  %v604_v58 = vadd.f32 %v603_v54, %v602_v24  ;;  %v627_v26 = vrot.slane %v626_v22, 2 }
  0xfb   : > { %v564_v20 = vadd.f32 %v563_v38, %v562_v62  ;;  %v587_v5 = vrot.slane %v586_v1, 1  ;;  %v610_v39 = vadd.f32 %v609_v48, %v608_v61  ;;  %v633_v33 = vrot.slane %v632_v52, 2 }
  0xfc   : > { %v570_v15 = vadd.f32 %v569_v55, %v568_v42  ;;  %v593_v21 = vrot.slane %v592_v32, 1  ;;  %v616_v28 = vadd.f32 %v615_v6, %v614_v40  ;;  %v639_v37 = vrot.slane %v638_v60, 2 }
  0xfd   : > { %v576_v49 = vadd.f32 %v575_v31, %v574_v43  ;;  %v599_v16 = vrot.slane %v598_v11, 1  ;;  %v622_v23 = vadd.f32 %v621_v4, %v620_v17  ;;  %2146 = vrcp.f32 %v552_v59 }
  0xfe   : > { %v582_v50 = vadd.f32 %v581_v41, %v580_v3  ;;  %v605_v18 = vrot.slane %v604_v58, 1  ;;  %v628_v25 = vadd.f32 %v627_v26, %v626_v22  ;;  %2148 = vrcp.f32 %v558_v7 }
  0xff   : > { %v588_v53 = vadd.f32 %v587_v5, %v586_v1  ;;  %v611_v8 = vrot.slane %v610_v39, 1  ;;  %v634_v24 = vadd.f32 %v633_v33, %v632_v52  ;;  %2150 = vrcp.f32 %v564_v20 }
 0x100   : > { %v594_v62 = vadd.f32 %v593_v21, %v592_v32  ;;  %v617_v63 = vrot.slane %v616_v28, 1  ;;  %v640_v61 = vadd.f32 %v639_v37, %v638_v60  ;;  %2152 = vrcp.f32 %v570_v15 }
 0x101   : > { %v600_v42 = vadd.f32 %v599_v16, %v598_v11  ;;  %v623_v27 = vrot.slane %v622_v23, 1  ;;  %2154 = vrcp.f32 %v576_v49  ;;  %v606_v40 = vadd.f32 %v605_v18, %v604_v58 }
 0x102   : > { %v629_v29 = vrot.slane %v628_v25, 1  ;;  %2156 = vrcp.f32 %v582_v50  ;;  %v612_v35 = vadd.f32 %v611_v8, %v610_v39  ;;  %v635_v43 = vrot.slane %v634_v24, 1 }
 0x103   : > { %2158 = vrcp.f32 %v588_v53  ;;  %v618_v10 = vadd.f32 %v617_v63, %v616_v28  ;;  %v641_v17 = vrot.slane %v640_v61, 1  ;;  %v624_v2 = vadd.f32 %v623_v27, %v622_v23 }
 0x104   : > { %2160 = vrcp.f32 %v594_v62  ;;  %v630_v3 = vadd.f32 %v629_v29, %v628_v25  ;;  %v636_v22 = vadd.f32 %v635_v43, %v634_v24 }
 0x105   : > { %2162 = vrcp.f32 %v600_v42  ;;  %v642_v1 = vadd.f32 %v641_v17, %v640_v61 }
 0x106   : > { %2164 = vrcp.f32 %v606_v40 }
 0x107   : > { %v2147_v54 = vpop.eup %2146  ;;  %2166 = vrcp.f32 %v612_v35 }
 0x108   : > { %v2149_v38 = vpop.eup %2148  ;;  %2168 = vrcp.f32 %v618_v10  ;;  %v659_v48 = vmul.f32 %v2147_v54, %v552_v59 }
 0x109   : > { %v2151_v52 = vpop.eup %2150  ;;  %2170 = vrcp.f32 %v624_v2  ;;  %v660_v55 = vmul.f32 %v2149_v38, %v558_v7 }
 0x10a   : > { %v2153_v32 = vpop.eup %2152  ;;  %2172 = vrcp.f32 %v630_v3  ;;  %v661_v6 = vmul.f32 %v2151_v52, %v564_v20  ;;  %v675_v60 = vsub.f32 2.0, %v659_v48 }
 0x10b   : > { %v2155_v31 = vpop.eup %2154  ;;  %2174 = vrcp.f32 %v636_v22  ;;  %v662_v11 = vmul.f32 %v2153_v32, %v570_v15  ;;  %v676_v4 = vsub.f32 2.0, %v660_v55 }
 0x10c   : > { %v2157_v41 = vpop.eup %2156  ;;  %2176 = vrcp.f32 %v642_v1  ;;  %v663_v58 = vmul.f32 %v2155_v31, %v576_v49  ;;  %v677_v26 = vsub.f32 2.0, %v661_v6  ;;  %v691_v37 = vmul.f32 %v2147_v54, %v675_v60 }
 0x10d   : > { %v2159_v5 = vpop.eup %2158  ;;  %v664_v39 = vmul.f32 %v2157_v41, %v582_v50  ;;  %v678_v33 = vsub.f32 2.0, %v662_v11  ;;  %v692_v20 = vmul.f32 %v2149_v38, %v676_v4 }
 0x10e   : > { %v2161_v21 = vpop.eup %2160  ;;  %v665_v59 = vmul.f32 %v2159_v5, %v588_v53  ;;  %v679_v28 = vsub.f32 2.0, %v663_v58  ;;  %v693_v15 = vmul.f32 %v2151_v52, %v677_v26  ;;  %v2805_v53 = vmul.f32 %v691_v37, %v2739_v12 }
 0x10f   : > { %v2163_v7 = vpop.eup %2162  ;;  %v666_v16 = vmul.f32 %v2161_v21, %v594_v62  ;;  %v680_v23 = vsub.f32 2.0, %v664_v39  ;;  %v694_v49 = vmul.f32 %v2153_v32, %v678_v33  ;;  %v2808_v38 = vmul.f32 %v692_v20, %v2742_v46 }
 0x110   : > { %v2165_v18 = vpop.eup %2164  ;;  %v667_v25 = vmul.f32 %v2163_v7, %v600_v42  ;;  %v681_v8 = vsub.f32 2.0, %v665_v59  ;;  %v695_v43 = vmul.f32 %v2155_v31, %v679_v28  ;;  %v709_v32 = vmul.f32 %v693_v15, %v2744_v14 }
 0x111   : > { %v2167_v24 = vpop.eup %2166  ;;  %v668_v63 = vmul.f32 %v2165_v18, %v606_v40  ;;  %v682_v61 = vsub.f32 2.0, %v666_v16  ;;  %v696_v48 = vmul.f32 %v2157_v41, %v680_v23  ;;  %v710_v12 = vmul.f32 %v694_v49, %v2746_v9 }
 0x112   : > { %v2169_v27 = vpop.eup %2168  ;;  %v669_v29 = vmul.f32 %v2167_v24, %v612_v35  ;;  %v683_v50 = vsub.f32 2.0, %v667_v25  ;;  %v697_v40 = vmul.f32 %v2159_v5, %v681_v8  ;;  %v711_v41 = vmul.f32 %v695_v43, %v2748_v45 }
 0x113   : > { %v2171_v17 = vpop.eup %2170  ;;  %v670_v54 = vmul.f32 %v2169_v27, %v618_v10  ;;  %v684_v62 = vsub.f32 2.0, %v668_v63  ;;  %v698_v31 = vmul.f32 %v2161_v21, %v682_v61 }
 0x114   : > { %v2173_v42 = vpop.eup %2172  ;;  %v671_v52 = vmul.f32 %v2171_v17, %v624_v2  ;;  %v685_v55 = vsub.f32 2.0, %v669_v29  ;;  %v699_v58 = vmul.f32 %v2163_v7, %v683_v50  ;;  %v712_v2 = vmul.f32 %v696_v48, %v2750_v51 }
 0x115   : > { %v2175_v6 = vpop.eup %2174  ;;  %v672_v35 = vmul.f32 %v2173_v42, %v630_v3  ;;  %v686_v60 = vsub.f32 2.0, %v670_v54  ;;  %v700_v39 = vmul.f32 %v2165_v18, %v684_v62  ;;  %v713_v14 = vmul.f32 %v697_v40, %v2752_v0 }
 0x116   : > { %v2177_v11 = vpop.eup %2176  ;;  %v673_v4 = vmul.f32 %v2175_v6, %v636_v22  ;;  %v687_v10 = vsub.f32 2.0, %v671_v52  ;;  %v701_v33 = vmul.f32 %v2167_v24, %v685_v55  ;;  %v723_v3 = vadd.f32 %v709_v32, %v2805_v53 }
 0x117   : > { %v674_v46 = vmul.f32 %v2177_v11, %v642_v1  ;;  %v688_v26 = vsub.f32 2.0, %v672_v35  ;;  %v702_v59 = vmul.f32 %v2169_v27, %v686_v60  ;;  %v714_v9 = vmul.f32 %v698_v31, %v2757_v56 }
 0x118   : > { %v689_v5 = vsub.f32 2.0, %v673_v4  ;;  %v730_v22 = vadd.f32 %v710_v12, %v2808_v38  ;;  %v703_v28 = vmul.f32 %v2171_v17, %v687_v10  ;;  %v715_v45 = vmul.f32 %v699_v58, %v2771_v13 }
 0x119   : > { %v690_v21 = vsub.f32 2.0, %v674_v46  ;;  %v724_v1 = vadd.f32 %v723_v3, %v711_v41  ;;  %v704_v37 = vmul.f32 %v2173_v42, %v688_v26  ;;  %v716_v7 = vmul.f32 %v700_v39, %v2773_v34 }
 0x11a   : > { %v731_v51 = vadd.f32 %v730_v22, %v712_v2  ;;  %v705_v16 = vmul.f32 %v2175_v6, %v689_v5  ;;  %v717_v23 = vmul.f32 %v701_v33, %v2775_v47  ;;  %v718_v18 = vmul.f32 %v702_v59, %v2777_v36 }
 0x11b   : > { %v725_v0 = vadd.f32 %v724_v1, %v713_v14  ;;  %v706_v20 = vmul.f32 %v2177_v11, %v690_v21  ;;  %v719_v56 = vmul.f32 %v703_v28, %v2779_v19  ;;  %v720_v15 = vmul.f32 %v704_v37, %v2781_v57 }
 0x11c   : > { %v732_v25 = vadd.f32 %v731_v51, %v714_v9  ;;  %v721_v13 = vmul.f32 %v705_v16, %v2783_v44 }
 0x11d   : > { %v726_v8 = vadd.f32 %v725_v0, %v715_v45  ;;  %v722_v34 = vmul.f32 %v706_v20, %v2785_v30 }
 0x11e   : > { %v733_v24 = vadd.f32 %v732_v25, %v716_v7 }
 0x11f   : > { %v727_v63 = vadd.f32 %v726_v8, %v717_v23 }
 0x120   : > { %v734_v61 = vadd.f32 %v733_v24, %v718_v18 }
 0x121   : > { %v728_v49 = vadd.f32 %v727_v63, %v719_v56 }
 0x122   : > { %v735_v27 = vadd.f32 %v734_v61, %v720_v15 }
 0x123   : > { %v729_v47 = vadd.f32 %v728_v49, %v721_v13 }
 0x124   : > { %v736_v29 = vadd.f32 %v735_v27, %v722_v34 }
 0x125   : > { %2178 = vrcp.f32 %v729_v47 }
 0x126   : > { %2180 = vrcp.f32 %v736_v29 }
 0x12f   : > { %v2179_v36 = vpop.eup %2178 }
 0x130   : > { %v2181_v50 = vpop.eup %2180  ;;  %v739_v43 = vmul.f32 %v2179_v36, %v729_v47 }
 0x131   : > { %v740_v19 = vmul.f32 %v2181_v50, %v736_v29 }
 0x132   : > { %v741_v17 = vsub.f32 2.0, %v739_v43 }
 0x133   : > { %v742_v54 = vsub.f32 2.0, %v740_v19 }
 0x134   : > { %v743_v57 = vmul.f32 %v2179_v36, %v741_v17 }
 0x135   : > { %v744_v62 = vmul.f32 %v2181_v50, %v742_v54 }
 0x136   : > { %v2827_v44 = vmul.f32 %v743_v57, %v2805_v53  ;;  %v2832_v48 = vmul.f32 %v743_v57, %v709_v32  ;;  %v2836_v52 = vmul.f32 %v743_v57, %v711_v41  ;;  %v2840_v40 = vmul.f32 %v743_v57, %v713_v14 }
 0x137   : > { %v2830_v30 = vmul.f32 %v744_v62, %v2808_v38  ;;  %v2834_v42 = vmul.f32 %v744_v62, %v710_v12  ;;  %v2838_v55 = vmul.f32 %v744_v62, %v712_v2  ;;  %v2845_v60 = vmul.f32 %v744_v62, %v714_v9 }
 0x138   : > { %v761_v6 = vrot.slane %v2827_v44, 4  ;;  %v773_v53 = vrot.slane %v2832_v48, 4  ;;  %v785_v31 = vrot.slane %v2836_v52, 4  ;;  %v797_v11 = vrot.slane %v2840_v40, 4 }
 0x139   : > { %v767_v35 = vrot.slane %v2830_v30, 4  ;;  %v779_v38 = vrot.slane %v2834_v42, 4  ;;  %v791_v12 = vrot.slane %v2838_v55, 4  ;;  %v803_v41 = vrot.slane %v2845_v60, 4 }
 0x13a   : > { %v762_v32 = vadd.f32 %v761_v6, %v2827_v44  ;;  %v774_v10 = vadd.f32 %v773_v53, %v2832_v48  ;;  %v786_v26 = vadd.f32 %v785_v31, %v2836_v52  ;;  %v798_v2 = vadd.f32 %v797_v11, %v2840_v40 }
 0x13b   : > { %v768_v4 = vadd.f32 %v767_v35, %v2830_v30  ;;  %v780_v58 = vadd.f32 %v779_v38, %v2834_v42  ;;  %v792_v39 = vadd.f32 %v791_v12, %v2838_v55  ;;  %v2859_v5 = vmul.f32 %v743_v57, %v715_v45 }
 0x13c   : > { %v763_v46 = vrot.slane %v762_v32, 2  ;;  %v2861_v33 = vmul.f32 %v744_v62, %v716_v7  ;;  %v2863_v14 = vmul.f32 %v743_v57, %v717_v23  ;;  %v2865_v3 = vmul.f32 %v744_v62, %v718_v18 }
 0x13d   : > { %v2867_v21 = vmul.f32 %v743_v57, %v719_v56  ;;  %v2869_v59 = vmul.f32 %v744_v62, %v720_v15  ;;  %v769_v9 = vrot.slane %v768_v4, 2  ;;  %v775_v22 = vrot.slane %v774_v10, 2 }
 0x13e   : > { %v2871_v28 = vmul.f32 %v743_v57, %v721_v13  ;;  %v2873_v1 = vmul.f32 %v744_v62, %v722_v34  ;;  %v781_v37 = vrot.slane %v780_v58, 2  ;;  %v804_v45 = vadd.f32 %v803_v41, %v2845_v60 }
 0x13f   : > { %v764_v51 = vadd.f32 %v763_v46, %v762_v32  ;;  %v787_v7 = vrot.slane %v786_v26, 2  ;;  %v793_v16 = vrot.slane %v792_v39, 2  ;;  %v799_v23 = vrot.slane %v798_v2, 2 }
 0x140   : > { %v809_v0 = vrot.slane %v2859_v5, 4  ;;  %v815_v20 = vrot.slane %v2861_v33, 4  ;;  %v821_v18 = vrot.slane %v2863_v14, 4  ;;  %v827_v25 = vrot.slane %v2865_v3, 4 }
 0x141   : > { %v770_v56 = vadd.f32 %v769_v9, %v768_v4  ;;  %v776_v8 = vadd.f32 %v775_v22, %v774_v10  ;;  %v833_v15 = vrot.slane %v2867_v21, 4  ;;  %v839_v24 = vrot.slane %v2869_v59, 4 }
 0x142   : > { %v810_v13 = vadd.f32 %v809_v0, %v2859_v5  ;;  %v816_v63 = vadd.f32 %v815_v20, %v2861_v33  ;;  %v822_v34 = vadd.f32 %v821_v18, %v2863_v14  ;;  %v845_v61 = vrot.slane %v2871_v28, 4 }
 0x143   : > { %v782_v49 = vadd.f32 %v781_v37, %v780_v58  ;;  %v805_v27 = vrot.slane %v804_v45, 2  ;;  %v828_v47 = vadd.f32 %v827_v25, %v2865_v3  ;;  %v851_v29 = vrot.slane %v2873_v1, 4 }
 0x144   : > { %v765_v36 = vrot.slane %v764_v51, 1  ;;  %v788_v50 = vadd.f32 %v787_v7, %v786_v26  ;;  %v811_v43 = vrot.slane %v810_v13, 2  ;;  %v834_v19 = vadd.f32 %v833_v15, %v2867_v21 }
 0x145   : > { %v771_v17 = vrot.slane %v770_v56, 1  ;;  %v794_v54 = vadd.f32 %v793_v16, %v792_v39  ;;  %v817_v57 = vrot.slane %v816_v63, 2  ;;  %v840_v62 = vadd.f32 %v839_v24, %v2869_v59 }
 0x146   : > { %v777_v6 = vrot.slane %v776_v8, 1  ;;  %v800_v35 = vadd.f32 %v799_v23, %v798_v2  ;;  %v823_v53 = vrot.slane %v822_v34, 2  ;;  %v846_v38 = vadd.f32 %v845_v61, %v2871_v28 }
 0x147   : > { %v783_v32 = vrot.slane %v782_v49, 1  ;;  %v806_v31 = vadd.f32 %v805_v27, %v804_v45  ;;  %v829_v12 = vrot.slane %v828_v47, 2  ;;  %v852_v11 = vadd.f32 %v851_v29, %v2873_v1 }
 0x148   : > { %v766_v4 = vadd.f32 %v765_v36, %v764_v51  ;;  %v789_v10 = vrot.slane %v788_v50, 1  ;;  %v812_v58 = vadd.f32 %v811_v43, %v810_v13  ;;  %v835_v41 = vrot.slane %v834_v19, 2 }
 0x149   : > { %v772_v46 = vadd.f32 %v771_v17, %v770_v56  ;;  %v795_v26 = vrot.slane %v794_v54, 1  ;;  %v818_v39 = vadd.f32 %v817_v57, %v816_v63  ;;  %v841_v9 = vrot.slane %v840_v62, 2 }
 0x14a   : > { %v778_v22 = vadd.f32 %v777_v6, %v776_v8  ;;  %v801_v37 = vrot.slane %v800_v35, 1  ;;  %v824_v7 = vadd.f32 %v823_v53, %v822_v34  ;;  %v847_v2 = vrot.slane %v846_v38, 2 }
 0x14b   : > { %v784_v16 = vadd.f32 %v783_v32, %v782_v49  ;;  %v807_v23 = vrot.slane %v806_v31, 1  ;;  %v830_v0 = vadd.f32 %v829_v12, %v828_v47  ;;  %v853_v20 = vrot.slane %v852_v11, 2 }
 0x14c   : > { %v790_v45 = vadd.f32 %v789_v10, %v788_v50  ;;  %v813_v18 = vrot.slane %v812_v58, 1  ;;  %v836_v25 = vadd.f32 %v835_v41, %v834_v19  ;;  %2182 = vrcp.f32 %v766_v4 }
 0x14d   : > { %v796_v51 = vadd.f32 %v795_v26, %v794_v54  ;;  %v819_v15 = vrot.slane %v818_v39, 1  ;;  %v842_v24 = vadd.f32 %v841_v9, %v840_v62  ;;  %2184 = vrcp.f32 %v772_v46 }
 0x14e   : > { %v802_v56 = vadd.f32 %v801_v37, %v800_v35  ;;  %v825_v13 = vrot.slane %v824_v7, 1  ;;  %v848_v63 = vadd.f32 %v847_v2, %v846_v38  ;;  %2186 = vrcp.f32 %v778_v22 }
 0x14f   : > { %v808_v8 = vadd.f32 %v807_v23, %v806_v31  ;;  %v831_v61 = vrot.slane %v830_v0, 1  ;;  %v854_v34 = vadd.f32 %v853_v20, %v852_v11  ;;  %2188 = vrcp.f32 %v784_v16 }
 0x150   : > { %v814_v49 = vadd.f32 %v813_v18, %v812_v58  ;;  %v837_v27 = vrot.slane %v836_v25, 1  ;;  %2190 = vrcp.f32 %v790_v45  ;;  %v820_v47 = vadd.f32 %v819_v15, %v818_v39 }
 0x151   : > { %v843_v29 = vrot.slane %v842_v24, 1  ;;  %2192 = vrcp.f32 %v796_v51  ;;  %v826_v36 = vadd.f32 %v825_v13, %v824_v7  ;;  %v849_v50 = vrot.slane %v848_v63, 1 }
 0x152   : > { %2194 = vrcp.f32 %v802_v56  ;;  %v832_v43 = vadd.f32 %v831_v61, %v830_v0  ;;  %v855_v19 = vrot.slane %v854_v34, 1  ;;  %v838_v17 = vadd.f32 %v837_v27, %v836_v25 }
 0x153   : > { %2196 = vrcp.f32 %v808_v8  ;;  %v844_v54 = vadd.f32 %v843_v29, %v842_v24  ;;  %v850_v62 = vadd.f32 %v849_v50, %v848_v63 }
 0x154   : > { %2198 = vrcp.f32 %v814_v49  ;;  %v856_v35 = vadd.f32 %v855_v19, %v854_v34 }
 0x155   : > { %2200 = vrcp.f32 %v820_v47 }
 0x156   : > { %v2183_v57 = vpop.eup %2182  ;;  %2202 = vrcp.f32 %v826_v36 }
 0x157   : > { %v2185_v6 = vpop.eup %2184  ;;  %2204 = vrcp.f32 %v832_v43  ;;  %v873_v53 = vmul.f32 %v2183_v57, %v766_v4 }
 0x158   : > { %v2187_v38 = vpop.eup %2186  ;;  %2206 = vrcp.f32 %v838_v17  ;;  %v874_v32 = vmul.f32 %v2185_v6, %v772_v46 }
 0x159   : > { %v2189_v31 = vpop.eup %2188  ;;  %2208 = vrcp.f32 %v844_v54  ;;  %v875_v12 = vmul.f32 %v2187_v38, %v778_v22  ;;  %v889_v11 = vsub.f32 2.0, %v873_v53 }
 0x15a   : > { %v2191_v10 = vpop.eup %2190  ;;  %2210 = vrcp.f32 %v850_v62  ;;  %v876_v58 = vmul.f32 %v2189_v31, %v784_v16  ;;  %v890_v41 = vsub.f32 2.0, %v874_v32 }
 0x15b   : > { %v2193_v26 = vpop.eup %2192  ;;  %2212 = vrcp.f32 %v856_v35  ;;  %v877_v39 = vmul.f32 %v2191_v10, %v790_v45  ;;  %v891_v9 = vsub.f32 2.0, %v875_v12  ;;  %v905_v20 = vmul.f32 %v2183_v57, %v889_v11 }
 0x15c   : > { %v2195_v37 = vpop.eup %2194  ;;  %v878_v7 = vmul.f32 %v2193_v26, %v796_v51  ;;  %v892_v2 = vsub.f32 2.0, %v876_v58  ;;  %v906_v22 = vmul.f32 %v2185_v6, %v890_v41 }
 0x15d   : > { %v2197_v23 = vpop.eup %2196  ;;  %v879_v4 = vmul.f32 %v2195_v37, %v802_v56  ;;  %v893_v0 = vsub.f32 2.0, %v877_v39  ;;  %v907_v16 = vmul.f32 %v2187_v38, %v891_v9  ;;  %v2893_v56 = vmul.f32 %v905_v20, %v2827_v44 }
 0x15e   : > { %v2199_v46 = vpop.eup %2198  ;;  %v880_v18 = vmul.f32 %v2197_v23, %v808_v8  ;;  %v894_v25 = vsub.f32 2.0, %v878_v7  ;;  %v908_v45 = vmul.f32 %v2189_v31, %v892_v2  ;;  %v2896_v6 = vmul.f32 %v906_v22, %v2830_v30 }
 0x15f   : > { %v2201_v15 = vpop.eup %2200  ;;  %v881_v24 = vmul.f32 %v2199_v46, %v814_v49  ;;  %v895_v13 = vsub.f32 2.0, %v879_v4  ;;  %v909_v50 = vmul.f32 %v2191_v10, %v893_v0  ;;  %v923_v31 = vmul.f32 %v907_v16, %v2832_v48 }
 0x160   : > { %v2203_v63 = vpop.eup %2202  ;;  %v882_v61 = vmul.f32 %v2201_v15, %v820_v47  ;;  %v896_v34 = vsub.f32 2.0, %v880_v18  ;;  %v910_v53 = vmul.f32 %v2193_v26, %v894_v25  ;;  %v924_v44 = vmul.f32 %v908_v45, %v2834_v42 }
 0x161   : > { %v2205_v27 = vpop.eup %2204  ;;  %v883_v29 = vmul.f32 %v2203_v63, %v826_v36  ;;  %v897_v51 = vsub.f32 2.0, %v881_v24  ;;  %v911_v47 = vmul.f32 %v2195_v37, %v895_v13  ;;  %v925_v26 = vmul.f32 %v909_v50, %v2836_v52 }
 0x162   : > { %v2207_v19 = vpop.eup %2206  ;;  %v884_v57 = vmul.f32 %v2205_v27, %v832_v43  ;;  %v898_v8 = vsub.f32 2.0, %v882_v61  ;;  %v912_v10 = vmul.f32 %v2197_v23, %v896_v34 }
 0x163   : > { %v2209_v49 = vpop.eup %2208  ;;  %v885_v38 = vmul.f32 %v2207_v19, %v838_v17  ;;  %v899_v32 = vsub.f32 2.0, %v883_v29  ;;  %v913_v39 = vmul.f32 %v2199_v46, %v897_v51  ;;  %v926_v17 = vmul.f32 %v910_v53, %v2838_v55 }
 0x164   : > { %v2211_v12 = vpop.eup %2210  ;;  %v886_v36 = vmul.f32 %v2209_v49, %v844_v54  ;;  %v900_v11 = vsub.f32 2.0, %v884_v57  ;;  %v914_v7 = vmul.f32 %v2201_v15, %v898_v8  ;;  %v927_v48 = vmul.f32 %v911_v47, %v2840_v40 }
 0x165   : > { %v2213_v58 = vpop.eup %2212  ;;  %v887_v41 = vmul.f32 %v2211_v12, %v850_v62  ;;  %v901_v43 = vsub.f32 2.0, %v885_v38  ;;  %v915_v2 = vmul.f32 %v2203_v63, %v899_v32  ;;  %v937_v54 = vadd.f32 %v923_v31, %v2893_v56 }
 0x166   : > { %v888_v30 = vmul.f32 %v2213_v58, %v856_v35  ;;  %v902_v9 = vsub.f32 2.0, %v886_v36  ;;  %v916_v4 = vmul.f32 %v2205_v27, %v900_v11  ;;  %v928_v42 = vmul.f32 %v912_v10, %v2845_v60 }
 0x167   : > { %v903_v37 = vsub.f32 2.0, %v887_v41  ;;  %v944_v62 = vadd.f32 %v924_v44, %v2896_v6  ;;  %v917_v0 = vmul.f32 %v2207_v19, %v901_v43  ;;  %v929_v52 = vmul.f32 %v913_v39, %v2859_v5 }
 0x168   : > { %v904_v23 = vsub.f32 2.0, %v888_v30  ;;  %v938_v35 = vadd.f32 %v937_v54, %v925_v26  ;;  %v918_v20 = vmul.f32 %v2209_v49, %v902_v9  ;;  %v930_v46 = vmul.f32 %v914_v7, %v2861_v33 }
 0x169   : > { %v945_v55 = vadd.f32 %v944_v62, %v926_v17  ;;  %v919_v18 = vmul.f32 %v2211_v12, %v903_v37  ;;  %v931_v25 = vmul.f32 %v915_v2, %v2863_v14  ;;  %v932_v15 = vmul.f32 %v916_v4, %v2865_v3 }
 0x16a   : > { %v939_v40 = vadd.f32 %v938_v35, %v927_v48  ;;  %v920_v22 = vmul.f32 %v2213_v58, %v904_v23  ;;  %v933_v60 = vmul.f32 %v917_v0, %v2867_v21  ;;  %v934_v16 = vmul.f32 %v918_v20, %v2869_v59 }
 0x16b   : > { %v946_v24 = vadd.f32 %v945_v55, %v928_v42  ;;  %v935_v5 = vmul.f32 %v919_v18, %v2871_v28 }
 0x16c   : > { %v940_v13 = vadd.f32 %v939_v40, %v929_v52  ;;  %v936_v33 = vmul.f32 %v920_v22, %v2873_v1 }
 0x16d   : > { %v947_v63 = vadd.f32 %v946_v24, %v930_v46 }
 0x16e   : > { %v941_v61 = vadd.f32 %v940_v13, %v931_v25 }
 0x16f   : > { %v948_v34 = vadd.f32 %v947_v63, %v932_v15 }
 0x170   : > { %v942_v45 = vadd.f32 %v941_v61, %v933_v60 }
 0x171   : > { %v949_v27 = vadd.f32 %v948_v34, %v934_v16 }
 0x172   : > { %v2914_v14 = vadd.f32 %v942_v45, %v935_v5 }
 0x173   : > { %v2916_v29 = vadd.f32 %v949_v27, %v936_v33 }
 0x174   : > { %2214 = vrcp.f32 %v2914_v14 }
 0x175   : > { %2216 = vrcp.f32 %v2916_v29 }
 0x17e   : > { %v2215_v3 = vpop.eup %2214 }
 0x17f   : > { %v2217_v21 = vpop.eup %2216  ;;  %v953_v59 = vmul.f32 %v2215_v3, %v2914_v14 }
 0x180   : > { %v954_v28 = vmul.f32 %v2217_v21, %v2916_v29 }
 0x181   : > { %v955_v51 = vsub.f32 2.0, %v953_v59 }
 0x182   : > { %v956_v50 = vsub.f32 2.0, %v954_v28 }
 0x183   : > { %v957_v1 = vmul.f32 %v2215_v3, %v955_v51 }
 0x184   : > { %v958_v19 = vmul.f32 %v2217_v21, %v956_v50 }
 0x185   : > { %v2923_v57 = vmul.f32 %v957_v1, %v2893_v56  ;;  %v2928_v53 = vmul.f32 %v957_v1, %v923_v31  ;;  %v2932_v38 = vmul.f32 %v957_v1, %v925_v26  ;;  %v2936_v47 = vmul.f32 %v957_v1, %v927_v48 }
 0x186   : > { %v2926_v8 = vmul.f32 %v958_v19, %v2896_v6  ;;  %v2930_v49 = vmul.f32 %v958_v19, %v924_v44  ;;  %v2934_v32 = vmul.f32 %v958_v19, %v926_v17  ;;  %v2941_v11 = vmul.f32 %v958_v19, %v928_v42 }
 0x187   : > { %v975_v12 = vrot.slane %v2923_v57, 4  ;;  %v987_v56 = vrot.slane %v2928_v53, 4  ;;  %v999_v10 = vrot.slane %v2932_v38, 4  ;;  %v1011_v58 = vrot.slane %v2936_v47, 4 }
 0x188   : > { %v981_v36 = vrot.slane %v2926_v8, 4  ;;  %v993_v6 = vrot.slane %v2930_v49, 4  ;;  %v1005_v44 = vrot.slane %v2934_v32, 4  ;;  %v1017_v26 = vrot.slane %v2941_v11, 4 }
 0x189   : > { %v976_v31 = vadd.f32 %v975_v12, %v2923_v57  ;;  %v988_v43 = vadd.f32 %v987_v56, %v2928_v53  ;;  %v1000_v9 = vadd.f32 %v999_v10, %v2932_v38  ;;  %v1012_v17 = vadd.f32 %v1011_v58, %v2936_v47 }
 0x18a   : > { %v982_v41 = vadd.f32 %v981_v36, %v2926_v8  ;;  %v994_v39 = vadd.f32 %v993_v6, %v2930_v49  ;;  %v1006_v7 = vadd.f32 %v1005_v44, %v2934_v32  ;;  %v2955_v37 = vmul.f32 %v957_v1, %v929_v52 }
 0x18b   : > { %v977_v30 = vrot.slane %v976_v31, 2  ;;  %v2957_v2 = vmul.f32 %v958_v19, %v930_v46  ;;  %v2959_v48 = vmul.f32 %v957_v1, %v931_v25  ;;  %v2961_v54 = vmul.f32 %v958_v19, %v932_v15 }
 0x18c   : > { %v2963_v23 = vmul.f32 %v957_v1, %v933_v60  ;;  %v2965_v4 = vmul.f32 %v958_v19, %v934_v16  ;;  %v983_v42 = vrot.slane %v982_v41, 2  ;;  %v989_v62 = vrot.slane %v988_v43, 2 }
 0x18d   : > { %v2967_v0 = vmul.f32 %v957_v1, %v935_v5  ;;  %v2969_v35 = vmul.f32 %v958_v19, %v936_v33  ;;  %v995_v20 = vrot.slane %v994_v39, 2  ;;  %v1018_v52 = vadd.f32 %v1017_v26, %v2941_v11 }
 0x18e   : > { %v978_v55 = vadd.f32 %v977_v30, %v976_v31  ;;  %v1001_v46 = vrot.slane %v1000_v9, 2  ;;  %v1007_v18 = vrot.slane %v1006_v7, 2  ;;  %v1013_v25 = vrot.slane %v1012_v17, 2 }
 0x18f   : > { %v1023_v40 = vrot.slane %v2955_v37, 4  ;;  %v1029_v22 = vrot.slane %v2957_v2, 4  ;;  %v1035_v15 = vrot.slane %v2959_v48, 4  ;;  %v1041_v24 = vrot.slane %v2961_v54, 4 }
 0x190   : > { %v984_v60 = vadd.f32 %v983_v42, %v982_v41  ;;  %v990_v13 = vadd.f32 %v989_v62, %v988_v43  ;;  %v1047_v16 = vrot.slane %v2963_v23, 4  ;;  %v1053_v63 = vrot.slane %v2965_v4, 4 }
 0x191   : > { %v1024_v5 = vadd.f32 %v1023_v40, %v2955_v37  ;;  %v1030_v61 = vadd.f32 %v1029_v22, %v2957_v2  ;;  %v1036_v33 = vadd.f32 %v1035_v15, %v2959_v48  ;;  %v1059_v34 = vrot.slane %v2967_v0, 4 }
 0x192   : > { %v996_v45 = vadd.f32 %v995_v20, %v994_v39  ;;  %v1019_v27 = vrot.slane %v1018_v52, 2  ;;  %v1042_v3 = vadd.f32 %v1041_v24, %v2961_v54  ;;  %v1065_v21 = vrot.slane %v2969_v35, 4 }
 0x193   : > { %v979_v59 = vrot.slane %v978_v55, 1  ;;  %v1002_v28 = vadd.f32 %v1001_v46, %v1000_v9  ;;  %v1025_v51 = vrot.slane %v1024_v5, 2  ;;  %v1048_v50 = vadd.f32 %v1047_v16, %v2963_v23 }
 0x194   : > { %v985_v1 = vrot.slane %v984_v60, 1  ;;  %v1008_v19 = vadd.f32 %v1007_v18, %v1006_v7  ;;  %v1031_v12 = vrot.slane %v1030_v61, 2  ;;  %v1054_v36 = vadd.f32 %v1053_v63, %v2965_v4 }
 0x195   : > { %v991_v56 = vrot.slane %v990_v13, 1  ;;  %v1014_v6 = vadd.f32 %v1013_v25, %v1012_v17  ;;  %v1037_v31 = vrot.slane %v1036_v33, 2  ;;  %v1060_v10 = vadd.f32 %v1059_v34, %v2967_v0 }
 0x196   : > { %v997_v44 = vrot.slane %v996_v45, 1  ;;  %v1020_v58 = vadd.f32 %v1019_v27, %v1018_v52  ;;  %v1043_v41 = vrot.slane %v1042_v3, 2  ;;  %v1066_v43 = vadd.f32 %v1065_v21, %v2969_v35 }
 0x197   : > { %v980_v39 = vadd.f32 %v979_v59, %v978_v55  ;;  %v1003_v26 = vrot.slane %v1002_v28, 1  ;;  %v1026_v30 = vadd.f32 %v1025_v51, %v1024_v5  ;;  %v1049_v9 = vrot.slane %v1048_v50, 2 }
 0x198   : > { %v986_v42 = vadd.f32 %v985_v1, %v984_v60  ;;  %v1009_v62 = vrot.slane %v1008_v19, 1  ;;  %v1032_v7 = vadd.f32 %v1031_v12, %v1030_v61  ;;  %v1055_v20 = vrot.slane %v1054_v36, 2 }
 0x199   : > { %v992_v46 = vadd.f32 %v991_v56, %v990_v13  ;;  %v1015_v18 = vrot.slane %v1014_v6, 1  ;;  %v1038_v40 = vadd.f32 %v1037_v31, %v1036_v33  ;;  %v1061_v17 = vrot.slane %v1060_v10, 2 }
 0x19a   : > { %v998_v25 = vadd.f32 %v997_v44, %v996_v45  ;;  %v1021_v22 = vrot.slane %v1020_v58, 1  ;;  %v1044_v15 = vadd.f32 %v1043_v41, %v1042_v3  ;;  %v1067_v24 = vrot.slane %v1066_v43, 2 }
 0x19b   : > { %v1004_v52 = vadd.f32 %v1003_v26, %v1002_v28  ;;  %v1027_v16 = vrot.slane %v1026_v30, 1  ;;  %v1050_v63 = vadd.f32 %v1049_v9, %v1048_v50  ;;  %2218 = vrcp.f32 %v980_v39 }
 0x19c   : > { %v1010_v55 = vadd.f32 %v1009_v62, %v1008_v19  ;;  %v1033_v34 = vrot.slane %v1032_v7, 1  ;;  %v1056_v5 = vadd.f32 %v1055_v20, %v1054_v36  ;;  %2220 = vrcp.f32 %v986_v42 }
 0x19d   : > { %v1016_v60 = vadd.f32 %v1015_v18, %v1014_v6  ;;  %v1039_v27 = vrot.slane %v1038_v40, 1  ;;  %v1062_v61 = vadd.f32 %v1061_v17, %v1060_v10  ;;  %2222 = vrcp.f32 %v992_v46 }
 0x19e   : > { %v1022_v13 = vadd.f32 %v1021_v22, %v1020_v58  ;;  %v1045_v21 = vrot.slane %v1044_v15, 1  ;;  %v1068_v33 = vadd.f32 %v1067_v24, %v1066_v43  ;;  %2224 = vrcp.f32 %v998_v25 }
 0x19f   : > { %v1028_v45 = vadd.f32 %v1027_v16, %v1026_v30  ;;  %v1051_v59 = vrot.slane %v1050_v63, 1  ;;  %2226 = vrcp.f32 %v1004_v52  ;;  %v1034_v3 = vadd.f32 %v1033_v34, %v1032_v7 }
 0x1a0   : > { %v1057_v28 = vrot.slane %v1056_v5, 1  ;;  %2228 = vrcp.f32 %v1010_v55  ;;  %v1040_v51 = vadd.f32 %v1039_v27, %v1038_v40  ;;  %v1063_v50 = vrot.slane %v1062_v61, 1 }
 0x1a1   : > { %2230 = vrcp.f32 %v1016_v60  ;;  %v1046_v1 = vadd.f32 %v1045_v21, %v1044_v15  ;;  %v1069_v19 = vrot.slane %v1068_v33, 1  ;;  %v1052_v12 = vadd.f32 %v1051_v59, %v1050_v63 }
 0x1a2   : > { %2232 = vrcp.f32 %v1022_v13  ;;  %v1058_v36 = vadd.f32 %v1057_v28, %v1056_v5  ;;  %v1064_v6 = vadd.f32 %v1063_v50, %v1062_v61 }
 0x1a3   : > { %2234 = vrcp.f32 %v1028_v45  ;;  %v1070_v10 = vadd.f32 %v1069_v19, %v1068_v33 }
 0x1a4   : > { %2236 = vrcp.f32 %v1034_v3 }
 0x1a5   : > { %v2219_v56 = vpop.eup %2218  ;;  %2238 = vrcp.f32 %v1040_v51 }
 0x1a6   : > { %v2221_v31 = vpop.eup %2220  ;;  %2240 = vrcp.f32 %v1046_v1  ;;  %v1087_v44 = vmul.f32 %v2219_v56, %v980_v39 }
 0x1a7   : > { %v2223_v58 = vpop.eup %2222  ;;  %2242 = vrcp.f32 %v1052_v12  ;;  %v1088_v41 = vmul.f32 %v2221_v31, %v986_v42 }
 0x1a8   : > { %v2225_v43 = vpop.eup %2224  ;;  %2244 = vrcp.f32 %v1058_v36  ;;  %v1089_v26 = vmul.f32 %v2223_v58, %v992_v46  ;;  %v1103_v30 = vsub.f32 2.0, %v1087_v44 }
 0x1a9   : > { %v2227_v9 = vpop.eup %2226  ;;  %2246 = vrcp.f32 %v1064_v6  ;;  %v1090_v62 = vmul.f32 %v2225_v43, %v998_v25  ;;  %v1104_v7 = vsub.f32 2.0, %v1088_v41 }
 0x1aa   : > { %v2229_v20 = vpop.eup %2228  ;;  %2248 = vrcp.f32 %v1070_v10  ;;  %v1091_v18 = vmul.f32 %v2227_v9, %v1004_v52  ;;  %v1105_v40 = vsub.f32 2.0, %v1089_v26  ;;  %v1119_v63 = vmul.f32 %v2219_v56, %v1103_v30 }
 0x1ab   : > { %v2231_v17 = vpop.eup %2230  ;;  %v1092_v22 = vmul.f32 %v2229_v20, %v1010_v55  ;;  %v1106_v15 = vsub.f32 2.0, %v1090_v62  ;;  %v1120_v46 = vmul.f32 %v2221_v31, %v1104_v7 }
 0x1ac   : > { %v2233_v24 = vpop.eup %2232  ;;  %v1093_v39 = vmul.f32 %v2231_v17, %v1016_v60  ;;  %v1107_v16 = vsub.f32 2.0, %v1091_v18  ;;  %v1121_v25 = vmul.f32 %v2223_v58, %v1105_v40  ;;  %v2989_v60 = vmul.f32 %v1119_v63, %v2923_v57  }
 0x1ad   : > { %v2235_v42 = vpop.eup %2234  ;;  %v1094_v34 = vmul.f32 %v2233_v24, %v1022_v13  ;;  %v1108_v5 = vsub.f32 2.0, %v1092_v22  ;;  %v1122_v52 = vmul.f32 %v2225_v43, %v1106_v15 }
 0x1ae   : > { %v2237_v27 = vpop.eup %2236  ;;  %v1095_v61 = vmul.f32 %v2235_v42, %v1028_v45  ;;  %v1109_v21 = vsub.f32 2.0, %v1093_v39  ;;  %v1123_v44 = vmul.f32 %v2227_v9, %v1107_v16  ;;  %v2995_v43 = vmul.f32 %v1121_v25, %v2928_v53  }
 0x1af   : > { %v2239_v33 = vpop.eup %2238  ;;  %v1096_v59 = vmul.f32 %v2237_v27, %v1034_v3  ;;  %v1110_v28 = vsub.f32 2.0, %v1094_v34  ;;  %v1124_v26 = vmul.f32 %v2229_v20, %v1108_v5  ;;  %v2998_v57 = vmul.f32 %v1122_v52, %v2930_v49  }
 0x1b0   : > { %v2241_v50 = vpop.eup %2240  ;;  %v1097_v19 = vmul.f32 %v2239_v33, %v1040_v51  ;;  %v1111_v55 = vsub.f32 2.0, %v1095_v61  ;;  %v1125_v3 = vmul.f32 %v2231_v17, %v1109_v21  ;;  %v1152_v49 = vadd.f32 %v2995_v43, %v2989_v60 }
 0x1b1   : > { %v2243_v56 = vpop.eup %2242  ;;  %v1098_v41 = vmul.f32 %v2241_v50, %v1046_v1  ;;  %v1112_v13 = vsub.f32 2.0, %v1096_v59  ;;  %v2992_v1 = vmul.f32 %v1120_v46, %v2926_v8   ;;  %v1126_v7 = vmul.f32 %v2233_v24, %v1110_v28 }
 0x1b2   : > { %v2245_v31 = vpop.eup %2244  ;;  %v1099_v58 = vmul.f32 %v2243_v56, %v1052_v12  ;;  %v1113_v30 = vsub.f32 2.0, %v1097_v19  ;;  %v1127_v22 = vmul.f32 %v2235_v42, %v1111_v55  ;;  %v3001_v8 = vmul.f32 %v1123_v44, %v2932_v38  }
 0x1b3   : > { %v3401_v45 = vmov %v2992_v1  ;;  %v2247_v51 = vpop.eup %2246  ;;  %v1100_v62 = vmul.f32 %v2245_v31, %v1058_v36  ;;  %v1114_v9 = vsub.f32 2.0, %v1098_v41  ;;  %v1128_v17 = vmul.f32 %v2237_v27, %v1112_v13 }
 0x1b4   : > { %v2249_v18 = vpop.eup %2248  ;;  %v1101_v40 = vmul.f32 %v2247_v51, %v1064_v6  ;;  %v1115_v20 = vsub.f32 2.0, %v1099_v58  ;;  %v3402_v39 = vmov %v3001_v8  ;;  %v3004_v5 = vmul.f32 %v1124_v26, %v2934_v32  }
 0x1b5   : > { %v1102_v1 = vmul.f32 %v2249_v18, %v1070_v10  ;;  %v1116_v12 = vsub.f32 2.0, %v1100_v62  ;;  %v1129_v36 = vmul.f32 %v2239_v33, %v1113_v30  ;;  %v3007_v6 = vmul.f32 %v1125_v3, %v2936_v47  }
 0x1b6   : > { %v3403_v53 = vmov %v3004_v5  ;;  %v1117_v15 = vsub.f32 2.0, %v1101_v40  ;;  %v1130_v63 = vmul.f32 %v2241_v50, %v1114_v9  ;;  %v3012_v7 = vmul.f32 %v1126_v7, %v2941_v11  }
 0x1b7   : > { %v3404_v24 = vmov %v3007_v6  ;;  %v1118_v16 = vsub.f32 2.0, %v1102_v1  ;;  %v1159_v10 = vadd.f32 %v2998_v57, %v3401_v45  ;;  %v1131_v42 = vmul.f32 %v2243_v56, %v1115_v20 }
 0x1b8   : > { %v3405_v38 = vmov %v3012_v7  ;;  %v3017_v8 = vmul.f32 %v1127_v22, %v2955_v37   ;;  %v1153_v34 = vadd.f32 %v1152_v49, %v3402_v39  ;;  %v1132_v5 = vmul.f32 %v2245_v31, %v1116_v12 }
 0x1b9   : > { %v3021_v9 = vmul.f32 %v1128_v17, %v2957_v2   ;;  %v1160_v6 = vadd.f32 %v1159_v10, %v3403_v53  ;;  %v1133_v46 = vmul.f32 %v2247_v51, %v1117_v15  ;;  %v3025_v10 = vmul.f32 %v1129_v36, %v2959_v48  }
 0x1ba   : > { %v3406_v32 = vmov %v3017_v8  ;;  %v1154_v11 = vadd.f32 %v1153_v34, %v3404_v24  ;;  %v1134_v61 = vmul.f32 %v2249_v18, %v1118_v16  ;;  %v3029_v21 = vmul.f32 %v1130_v63, %v2961_v54  }
 0x1bb   : > { %v3407_v47 = vmov %v3021_v9  ;;  %3408 = vst [vmem:[#allocation12_spill] sm:$0xff] %v3025_v10  ;;  %v3409_v27 = vmov %v3025_v10  ;;  %v1161_v37 = vadd.f32 %v1160_v6, %v3405_v38  ;;  %v3033_v12 = vmul.f32 %v1131_v42, %v2963_v23  }
 0x1bc   : > { %3410 = vst [vmem:[#allocation13_spill] sm:$0xff] %v3029_v21  ;;  %v1155_v2 = vadd.f32 %v1154_v11, %v3406_v32  ;;  %v3037_v13 = vmul.f32 %v1132_v5, %v2965_v4   ;;  %v3041_v48 = vmul.f32 %v1133_v46, %v2967_v0   ;;  %v3045_v15 = vmul.f32 %v1134_v61, %v2969_v35  }
 0x1bd   : > { %3411 = vst [vmem:[#allocation14_spill] sm:$0xff] %v3033_v12  ;;  %v3412_v25 = vmov %v3033_v12  ;;  %v1162_v59 = vadd.f32 %v1161_v37, %v3407_v47  ;;  %v3423_v11 = vmov %v3029_v21  ;;  %v3424_v10 = vmov %v3409_v27 }
 0x1be   : > { %3413 = vst [vmem:[#allocation15_spill] sm:$0xff] %v3037_v13  ;;  %v3414_v33 = vmov %v3037_v13  ;;  %3415 = vst [vmem:[#allocation16_spill] sm:$0xff] %v3041_v48  ;;  %v1156_v28 = vadd.f32 %v1155_v2, %v3409_v27  ;;  %v3417_v54 = vmov %v3045_v15  ;;  %v3422_v12 = vmov %v3412_v25 }
 0x1bf   : > { %3416 = vst [vmem:[#allocation17_spill] sm:$0xff] %v3045_v15  ;;  %v1163_v52 = vadd.f32 %v1162_v59, %v3029_v21  ;;  %v3419_v15 = vmov %v3417_v54  ;;  %v3425_v9 = vmov %v3407_v47  ;;  %v3426_v8 = vmov %v3406_v32 }
 0x1c0   : > { %v1157_v23 = vadd.f32 %v1156_v28, %v3412_v25  ;;  %v3427_v7 = vmov %v3405_v38  ;;  %v3428_v6 = vmov %v3404_v24  ;;  %v3429_v5 = vmov %v3403_v53 }
 0x1c1   : > { %v1164_v50 = vadd.f32 %v1163_v52, %v3414_v33  ;;  %v3432_v2 = vmov %v2995_v43  ;;  %v3433_v1 = vmov %v3401_v45 }
 0x1c2   : > { %v1158_v19 = vadd.f32 %v1157_v23, %v3041_v48 }
 0x1c3   : > { %v1165_v4 = vadd.f32 %v1164_v50, %v3417_v54 }
 0x1c4   : > { %v1166_v55 = vsub.f32 %v2914_v14, %v1158_v19  ;;  %v3420_v14 = vmov %v3041_v48 }
 0x1c5   : > { %v1167_v0 = vsub.f32 %v2916_v29, %v1165_v4  ;;  %v3430_v4 = vmov %v3402_v39 }
 0x1c6   : > { %v1168_v44 = vand.u32 2147483647, %v1166_v55 }
 0x1c7   : > { %v1169_v56 = vand.u32 2147483647, %v1167_v0  ;;  %v3434_v0 = vmov %v2989_v60 }
 0x1c9   : > { %v1170_v41 = vmax.f32.f32 %v1168_v44, %v1169_v56 }
 0x1cb   : > { %1171 = vmax.xlane.f32.xlu0 %v1170_v41 }
 0x258   : > { %v1172_v35 = vpop.xlane.xlu0 %1171 }
 0x259   : > { %v1173_v13 = vrot.slane %v1172_v35, 4 }
 0x25b   : > { %v1174_v26 = vmax.f32 %v1172_v35, %v1173_v13  ;;  %v3421_v13 = vmov %v3414_v33 }
 0x25d   : > { %v1175_v31 = vrot.slane %v1174_v26, 2 }
 0x25f   : > { %v1176_v58 = vmax.f32 %v1174_v26, %v1175_v31 }
 0x261   : > { %v1177_v30 = vrot.slane %v1176_v58, 1 }
 0x263   : > { %v1178_v3 = vmax.f32 %v1176_v58, %v1177_v30 }
 0x265   : > { %1927 = vpush %v1178_v3  ;;  %v3431_v3 = vmov %v2998_v57 }
 0x296   : > { %s1928_s4 = spop %1927 }
 0x297   : > { %p1181_p0 = scmp.gt.f32.partialorder %s1928_s4, 1e-06 }
 0x299   : > { %p3055_p1 = pnand %p1181_p0, %p1180_p13 }
 0x29a   :  { %s1184_s6 = sld [smem:[#allocation2]] (%p3055_p1)  ;;  %s3112_s8 = sld [smem:[#allocation7 + $0x1]] (%p3055_p1)  ;;  %vm1812_vm0 = vcmask (%p3055_p1), 1041409   ;;  %vm1815_vm1 = vcmask (%p3055_p1), 1042434   ;;  %vm1818_vm2 = vcmask (%p3055_p1), 1043459   ;;  %vm1821_vm3 = vcmask (%p3055_p1), 1044484  }
 0x29b   :  { %80 = sbr.rel (!%p3055_p1) target bundleno = 42 (0x2a), region = 47  ;;  %s1187_s7 = sld [smem:[#allocation7]] (%p3055_p1)  ;;  %vm1824_vm4 = vcmask (%p3055_p1), 1045509   ;;  %vm1827_vm5 = vcmask (%p3055_p1), 1046534   ;;  %vm1830_vm6 = vcmask (%p3055_p1), 1047559  }
 0x29c   :  { %s3114_s9 = sld [smem:[#allocation7 + $0x2]] (%p3055_p1)  ;;  %s3120_s10 = sld [smem:[#allocation7 + $0x3]] (%p3055_p1) }
 0x29d   :  { %s3122_s11 = sld [smem:[#allocation7 + $0x4]] (%p3055_p1)  ;;  %s3257_s12 = sld [smem:[#allocation7 + $0x5]] (%p3055_p1) }
 0x29e   :  { %s3259_s13 = sld [smem:[#allocation7 + $0x6]] (%p3055_p1)  ;;  %s3261_s14 = sld [smem:[#allocation7 + $0x7]] (%p3055_p1) }
 0x29f   :  { %s2452_s15 = smov (%p3055_p1), [#allocation8]  }
 0x2a0   :  { %v1185_v51 = vstv (%p3055_p1), %s1184_s6  ;;  %v1222_v19 = vstv (%p3055_p1), %s3112_s8  ;;  %s1856_s16 = sshll.u32 (%p3055_p1), %s2452_s15, 4  ;;  %s1857_s16 = int_to_ptr.vmem [resolvable:$true] %s1856_s16 }
 0x2a1   :  { %v1188_v29 = vstv (%p3055_p1), %s1187_s7  ;;  %v1223_v4 = vmul.f32 (%p3055_p1), %v1222_v19, %v2989_v60  ;;  %v1224_v56 = vmul.f32 (%p3055_p1), %v1222_v19, %v3401_v45  ;;  %v1225_v41 = vmul.f32 (%p3055_p1), %v1222_v19, %v2995_v43  ;;  %s2284_s17 = scalar_lea.vmem (%p3055_p1), %s1857_s16, 256  ;;  %p2289_p3 = scmp.lt.s32.totalorder (%p3055_p1), %s1857_s16, %s1857_s16 }
 0x2a2   :  { %v1189_v62 = vmul.f32 %v1188_v29, %v2989_v60  ;;  %v1190_v18 = vmul.f32 %v1188_v29, %v3401_v45  ;;  %v1191_v40 = vmul.f32 %v1188_v29, %v2995_v43  ;;  %v1192_v20 = vmul.f32 %v1188_v29, %v2998_v57  ;;  %p2285_p2 = scmp.ne.s32.totalorder %s1857_s16, %s2284_s17  ;;  %p2290_p4 = scmp.lt.s32.totalorder %s2284_s17, %s2284_s17 }
 0x2a3   :  { %v1193_v22 = vmul.f32 %v1188_v29, %v3402_v39  ;;  %v1194_v14 = vmul.f32 %v1188_v29, %v3403_v53  ;;  %v1195_v9 = vmul.f32 %v1188_v29, %v3404_v24  ;;  %v1196_v7 = vmul.f32 %v1188_v29, %v3405_v38 }
 0x2a4   :  { %v1197_v8 = vmul.f32 %v1188_v29, %v3406_v32  ;;  %v1198_v1 = vmul.f32 %v1188_v29, %v3407_v47  ;;  %v1199_v12 = vmul.f32 %v1188_v29, %v3409_v27  ;;  %v1200_v17 = vmul.f32 %v1188_v29, %v3029_v21  ;;  %p2291_p5 = por %p2290_p4, %p2289_p3 }
 0x2a5   :  { %v1201_v15 = vmul.f32 %v1188_v29, %v3412_v25  ;;  %v1202_v36 = vmul.f32 %v1188_v29, %v3414_v33  ;;  %v1203_v49 = vmul.f32 %v1188_v29, %v3041_v48  ;;  %v1204_v16 = vmul.f32 %v1188_v29, %v3417_v54 }
 0x2a6   :  { %v1205_v63 = vadd.f32 %v1189_v62, %v1185_v51  ;;  %v1206_v10 = vadd.f32 %v1190_v18, %v1185_v51  ;;  %v1207_v42 = vadd.f32 %v1191_v40, %v1185_v51  ;;  %v1208_v34 = vadd.f32 %v1192_v20, %v1185_v51  ;;  %p2292_p6 = pnand %p2291_p5, %p2285_p2 }
 0x2a7   :  { %v1209_v5 = vadd.f32 %v1193_v22, %v1185_v51  ;;  %v1210_v6 = vadd.f32 %v1194_v14, %v1185_v51  ;;  %v1211_v46 = vadd.f32 %v1195_v9, %v1185_v51  ;;  %v1212_v11 = vadd.f32 %v1196_v7, %v1185_v51 }
 0x2a8   :  { %v1213_v61 = vadd.f32 %v1197_v8, %v1185_v51  ;;  %v1214_v37 = vadd.f32 %v1198_v1, %v1185_v51  ;;  %v1215_v2 = vadd.f32 %v1199_v12, %v1185_v51  ;;  %v1216_v59 = vadd.f32 %v1200_v17, %v1185_v51 }
 0x2a9   :  { %v1217_v28 = vadd.f32 %v1201_v15, %v1185_v51  ;;  %v1218_v52 = vadd.f32 %v1202_v36, %v1185_v51  ;;  %v1219_v23 = vadd.f32 %v1203_v49, %v1185_v51  ;;  %v1220_v50 = vadd.f32 %v1204_v16, %v1185_v51 }
 0x2aa   :  { %v3138_v55 = vstv %s3114_s9  ;;  %v3141_v0 = vstv %s3120_s10  ;;  %v3144_v44 = vstv %s3122_s11  ;;  %v1226_v35 = vmul.f32 %v1222_v19, %v2998_v57 }
 0x2ab   :  { %3435 = vst [vmem:[#allocation18_spill] sm:$0xff] %v3141_v0  ;;  %3436 = vst [vmem:[#allocation19_spill] sm:$0xff] %v3144_v44  ;;  %v1227_v13 = vmul.f32 %v1222_v19, %v3402_v39  ;;  %v1228_v26 = vmul.f32 %v1222_v19, %v3403_v53  ;;  %v1229_v31 = vmul.f32 %v1222_v19, %v3404_v24  ;;  %v1255_v22 = vrot.slane %v1223_v4, 1 }
 0x2ac   :  { %v1230_v58 = vmul.f32 %v1222_v19, %v3405_v38  ;;  %v1231_v30 = vmul.f32 %v1222_v19, %v3406_v32  ;;  %v1232_v3 = vmul.f32 %v1222_v19, %v3407_v47  ;;  %v1233_v29 = vmul.f32 %v1222_v19, %v3409_v27 }
 0x2ad   :  { %v1234_v51 = vmul.f32 %v1222_v19, %v3029_v21  ;;  %v1235_v62 = vmul.f32 %v1222_v19, %v3412_v25  ;;  %v1236_v18 = vmul.f32 %v1222_v19, %v3414_v33  ;;  %v1237_v40 = vmul.f32 %v1222_v19, %v3041_v48 }
 0x2ae   :  { %v1238_v20 = vmul.f32 %v1222_v19, %v3417_v54  ;;  %v1256_v14 = vrot.slane %v1224_v56, 1  ;;  %v1257_v9 = vrot.slane %v1225_v41, 1  ;;  %v1258_v7 = vrot.slane %v1226_v35, 1 }
 0x2af   :  { %v1259_v8 = vrot.slane %v1227_v13, 1  ;;  %v1260_v1 = vrot.slane %v1228_v26, 1  ;;  %v1261_v12 = vrot.slane %v1229_v31, 1  ;;  %v1262_v17 = vrot.slane %v1230_v58, 1 }
 0x2b0   :  { %v1263_v15 = vrot.slane %v1231_v30, 1  ;;  %v1264_v36 = vrot.slane %v1232_v3, 1  ;;  %v1265_v49 = vrot.slane %v1233_v29, 1  ;;  %v1266_v16 = vrot.slane %v1234_v51, 1 }
 0x2b1   :  { %v1267_v44 = vrot.slane %v1235_v62, 1  ;;  %v1268_v0 = vrot.slane %v1236_v18, 1  ;;  %v1269_v25 = vrot.slane %v1237_v40, 1  ;;  %v1270_v33 = vrot.slane %v1238_v20, 1 }
 0x2b2   :  { %v1287_v21 = vadd.f32 %v1255_v22, %v1205_v63  ;;  %v1288_v48 = vadd.f32 %v1256_v14, %v1206_v10  ;;  %v1289_v27 = vadd.f32 %v1257_v9, %v1207_v42  ;;  %v1290_v19 = vadd.f32 %v1258_v7, %v1208_v34 }
 0x2b3   :  { %v1291_v4 = vadd.f32 %v1259_v8, %v1209_v5  ;;  %v1292_v56 = vadd.f32 %v1260_v1, %v1210_v6  ;;  %v1293_v41 = vadd.f32 %v1261_v12, %v1211_v46  ;;  %v1294_v35 = vadd.f32 %v1262_v17, %v1212_v11  ;;  %v3437_v11 = vld [vmem:[#allocation12_spill] sm:$0xff] }
 0x2b4   :  { %v1295_v13 = vadd.f32 %v1263_v15, %v1213_v61  ;;  %v1296_v26 = vadd.f32 %v1264_v36, %v1214_v37  ;;  %v1297_v31 = vadd.f32 %v1265_v49, %v1215_v2  ;;  %v1298_v58 = vadd.f32 %v1266_v16, %v1216_v59  ;;  %v3438_v37 = vld [vmem:[#allocation13_spill] sm:$0xff]  ;;  %v3439_v59 = vld [vmem:[#allocation14_spill] sm:$0xff] }
 0x2b5   :  { %v1299_v30 = vadd.f32 %v1267_v44, %v1217_v28  ;;  %v1300_v3 = vadd.f32 %v1268_v0, %v1218_v52  ;;  %v1301_v29 = vadd.f32 %v1269_v25, %v1219_v23  ;;  %v1302_v51 = vadd.f32 %v1270_v33, %v1220_v50  ;;  %v3440_v52 = vld [vmem:[#allocation15_spill] sm:$0xff]  ;;  %v3441_v50 = vld [vmem:[#allocation16_spill] sm:$0xff] }
 0x2b6   :  { %v1305_v62 = vmul.f32 %v3138_v55, %v2989_v60  ;;  %v1306_v63 = vmul.f32 %v3138_v55, %v3401_v45  ;;  %v1307_v10 = vmul.f32 %v3138_v55, %v2995_v43  ;;  %v1308_v42 = vmul.f32 %v3138_v55, %v2998_v57 }
 0x2b7   :  { %v1309_v34 = vmul.f32 %v3138_v55, %v3402_v39  ;;  %v1310_v5 = vmul.f32 %v3138_v55, %v3403_v53  ;;  %v1311_v25 = vmul.f32 %v3138_v55, %v3404_v24  ;;  %v1312_v33 = vmul.f32 %v3138_v55, %v3405_v38 }
 0x2b8   :  { %v1313_v6 = vmul.f32 %v3138_v55, %v3406_v32  ;;  %v1314_v46 = vmul.f32 %v3138_v55, %v3407_v47  ;;  %v1315_v61 = vmul.f32 %v3138_v55, %v3437_v11  ;;  %v1316_v2 = vmul.f32 %v3138_v55, %v3438_v37 }
 0x2b9   :  { %v1317_v28 = vmul.f32 %v3138_v55, %v3439_v59  ;;  %v1318_v23 = vmul.f32 %v3138_v55, %v3440_v52  ;;  %v1319_v0 = vmul.f32 %v3138_v55, %v3441_v50  ;;  %v1320_v44 = vmul.f32 %v3138_v55, %v3417_v54 }
 0x2ba   :  { %v1337_v18 = vrot.slane %v1305_v62, 2  ;;  %v1338_v40 = vrot.slane %v1306_v63, 2  ;;  %v1339_v20 = vrot.slane %v1307_v10, 2  ;;  %v1340_v22 = vrot.slane %v1308_v42, 2 }
 0x2bb   :  { %v1341_v14 = vrot.slane %v1309_v34, 2  ;;  %v1342_v9 = vrot.slane %v1310_v5, 2  ;;  %v1343_v7 = vrot.slane %v1311_v25, 2  ;;  %v1344_v8 = vrot.slane %v1312_v33, 2 }
 0x2bc   :  { %v1345_v1 = vrot.slane %v1313_v6, 2  ;;  %v1346_v12 = vrot.slane %v1314_v46, 2  ;;  %v1347_v17 = vrot.slane %v1315_v61, 2  ;;  %v1348_v15 = vrot.slane %v1316_v2, 2 }
 0x2bd   :  { %v1349_v36 = vrot.slane %v1317_v28, 2  ;;  %v1350_v49 = vrot.slane %v1318_v23, 2  ;;  %v1351_v16 = vrot.slane %v1319_v0, 2  ;;  %v1352_v52 = vrot.slane %v1320_v44, 2  ;;  %v3442_v28 = vld [vmem:[#allocation18_spill] sm:$0xff] }
 0x2be   :  { %v1369_v50 = vadd.f32 %v1337_v18, %v1287_v21  ;;  %v1370_v59 = vadd.f32 %v1338_v40, %v1288_v48  ;;  %v1371_v37 = vadd.f32 %v1339_v20, %v1289_v27  ;;  %v1372_v55 = vadd.f32 %v1340_v22, %v1290_v19 }
 0x2bf   :  { %v1373_v62 = vadd.f32 %v1341_v14, %v1291_v4  ;;  %v1374_v63 = vadd.f32 %v1342_v9, %v1292_v56  ;;  %v1375_v10 = vadd.f32 %v1343_v7, %v1293_v41  ;;  %v1376_v42 = vadd.f32 %v1344_v8, %v1294_v35 }
 0x2c0   :  { %v1377_v34 = vadd.f32 %v1345_v1, %v1295_v13  ;;  %v1378_v5 = vadd.f32 %v1346_v12, %v1296_v26  ;;  %v1379_v25 = vadd.f32 %v1347_v17, %v1297_v31  ;;  %v1380_v33 = vadd.f32 %v1348_v15, %v1298_v58  ;;  %v3443_v31 = vld [vmem:[#allocation13_spill] sm:$0xff] }
 0x2c1   :  { %v1381_v6 = vadd.f32 %v1349_v36, %v1299_v30  ;;  %v1382_v46 = vadd.f32 %v1350_v49, %v1300_v3  ;;  %v1383_v61 = vadd.f32 %v1351_v16, %v1301_v29  ;;  %v1384_v2 = vadd.f32 %v1352_v52, %v1302_v51  ;;  %v3444_v30 = vld [vmem:[#allocation14_spill] sm:$0xff]  ;;  %v3445_v29 = vld [vmem:[#allocation15_spill] sm:$0xff]  ;;  %v3446_v52 = vld [vmem:[#allocation16_spill] sm:$0xff] }
 0x2c2   :  { %v1387_v23 = vmul.f32 %v3442_v28, %v2989_v60  ;;  %v1388_v21 = vmul.f32 %v3442_v28, %v3401_v45  ;;  %v1389_v27 = vmul.f32 %v3442_v28, %v2995_v43  ;;  %v1390_v48 = vmul.f32 %v3442_v28, %v2998_v57 }
 0x2c3   :  { %v1391_v19 = vmul.f32 %v3442_v28, %v3402_v39  ;;  %v1392_v4 = vmul.f32 %v3442_v28, %v3403_v53  ;;  %v1393_v56 = vmul.f32 %v3442_v28, %v3404_v24  ;;  %v1394_v41 = vmul.f32 %v3442_v28, %v3405_v38 }
 0x2c4   :  { %v1395_v35 = vmul.f32 %v3442_v28, %v3406_v32  ;;  %v1396_v13 = vmul.f32 %v3442_v28, %v3407_v47  ;;  %v1397_v26 = vmul.f32 %v3442_v28, %v3437_v11  ;;  %v1398_v58 = vmul.f32 %v3442_v28, %v3443_v31 }
 0x2c5   :  { %v1399_v3 = vmul.f32 %v3442_v28, %v3444_v30  ;;  %v1400_v51 = vmul.f32 %v3442_v28, %v3445_v29  ;;  %v1401_v0 = vmul.f32 %v3442_v28, %v3446_v52  ;;  %v1402_v44 = vmul.f32 %v3442_v28, %v3417_v54 }
 0x2c6   :  { %v1419_v18 = vrot.slane %v1387_v23, 3  ;;  %v1420_v40 = vrot.slane %v1388_v21, 3  ;;  %v1421_v20 = vrot.slane %v1389_v27, 3  ;;  %v1422_v22 = vrot.slane %v1390_v48, 3 }
 0x2c7   :  { %v1423_v14 = vrot.slane %v1391_v19, 3  ;;  %v1424_v9 = vrot.slane %v1392_v4, 3  ;;  %v1425_v7 = vrot.slane %v1393_v56, 3  ;;  %v1426_v8 = vrot.slane %v1394_v41, 3 }
 0x2c8   :  { %v1427_v1 = vrot.slane %v1395_v35, 3  ;;  %v1428_v12 = vrot.slane %v1396_v13, 3  ;;  %v1429_v17 = vrot.slane %v1397_v26, 3  ;;  %v1430_v15 = vrot.slane %v1398_v58, 3 }
 0x2c9   :  { %v1431_v36 = vrot.slane %v1399_v3, 3  ;;  %v1432_v49 = vrot.slane %v1400_v51, 3  ;;  %v1433_v16 = vrot.slane %v1401_v0, 3  ;;  %v1434_v29 = vrot.slane %v1402_v44, 3  ;;  %v3447_v3 = vld [vmem:[#allocation19_spill] sm:$0xff] }
 0x2ca   :  { %v1451_v52 = vadd.f32 %v1419_v18, %v1369_v50  ;;  %v1452_v30 = vadd.f32 %v1420_v40, %v1370_v59  ;;  %v1453_v31 = vadd.f32 %v1421_v20, %v1371_v37  ;;  %v1454_v28 = vadd.f32 %v1422_v22, %v1372_v55 }
 0x2cb   :  { %v1455_v23 = vadd.f32 %v1423_v14, %v1373_v62  ;;  %v1456_v21 = vadd.f32 %v1424_v9, %v1374_v63  ;;  %v1457_v27 = vadd.f32 %v1425_v7, %v1375_v10  ;;  %v1458_v48 = vadd.f32 %v1426_v8, %v1376_v42 }
 0x2cc   :  { %v1459_v19 = vadd.f32 %v1427_v1, %v1377_v34  ;;  %v1460_v4 = vadd.f32 %v1428_v12, %v1378_v5  ;;  %v1461_v56 = vadd.f32 %v1429_v17, %v1379_v25  ;;  %v1462_v41 = vadd.f32 %v1430_v15, %v1380_v33  ;;  %v3448_v25 = vld [vmem:[#allocation13_spill] sm:$0xff] }
 0x2cd   :  { %v1463_v35 = vadd.f32 %v1431_v36, %v1381_v6  ;;  %v1464_v13 = vadd.f32 %v1432_v49, %v1382_v46  ;;  %v1465_v26 = vadd.f32 %v1433_v16, %v1383_v61  ;;  %v1466_v58 = vadd.f32 %v1434_v29, %v1384_v2  ;;  %v3449_v6 = vld [vmem:[#allocation14_spill] sm:$0xff]  ;;  %v3450_v61 = vld [vmem:[#allocation15_spill] sm:$0xff]  ;;  %v3451_v29 = vld [vmem:[#allocation16_spill] sm:$0xff] }
 0x2ce   :  { %v1469_v51 = vmul.f32 %v3447_v3, %v2989_v60  ;;  %v1470_v59 = vmul.f32 %v3447_v3, %v3401_v45  ;;  %v1471_v37 = vmul.f32 %v3447_v3, %v2995_v43  ;;  %v1472_v50 = vmul.f32 %v3447_v3, %v2998_v57 }
 0x2cf   :  { %v1473_v55 = vmul.f32 %v3447_v3, %v3402_v39  ;;  %v1474_v62 = vmul.f32 %v3447_v3, %v3403_v53  ;;  %v1475_v63 = vmul.f32 %v3447_v3, %v3404_v24  ;;  %v1476_v10 = vmul.f32 %v3447_v3, %v3405_v38 }
 0x2d0   :  { %v1477_v42 = vmul.f32 %v3447_v3, %v3406_v32  ;;  %v1478_v34 = vmul.f32 %v3447_v3, %v3407_v47  ;;  %v1479_v5 = vmul.f32 %v3447_v3, %v3437_v11  ;;  %v1480_v33 = vmul.f32 %v3447_v3, %v3448_v25 }
 0x2d1   :  { %v1481_v46 = vmul.f32 %v3447_v3, %v3449_v6  ;;  %v1482_v2 = vmul.f32 %v3447_v3, %v3450_v61  ;;  %v1483_v0 = vmul.f32 %v3447_v3, %v3451_v29  ;;  %v1484_v44 = vmul.f32 %v3447_v3, %v3417_v54 }
 0x2d2   :  { %v1501_v18 = vrot.slane %v1469_v51, 4  ;;  %v1502_v40 = vrot.slane %v1470_v59, 4  ;;  %v1503_v20 = vrot.slane %v1471_v37, 4  ;;  %v1504_v22 = vrot.slane %v1472_v50, 4 }
 0x2d3   :  { %v1505_v14 = vrot.slane %v1473_v55, 4  ;;  %v1506_v9 = vrot.slane %v1474_v62, 4  ;;  %v1507_v7 = vrot.slane %v1475_v63, 4  ;;  %v1508_v8 = vrot.slane %v1476_v10, 4 }
 0x2d4   :  { %v1509_v1 = vrot.slane %v1477_v42, 4  ;;  %v1510_v12 = vrot.slane %v1478_v34, 4  ;;  %v1511_v17 = vrot.slane %v1479_v5, 4  ;;  %v1512_v15 = vrot.slane %v1480_v33, 4 }
 0x2d5   :  { %v1513_v36 = vrot.slane %v1481_v46, 4  ;;  %v1514_v49 = vrot.slane %v1482_v2, 4  ;;  %v1515_v16 = vrot.slane %v1483_v0, 4  ;;  %v1516_v3 = vrot.slane %v1484_v44, 4 }
 0x2d6   :  { %v1533_v51 = vadd.f32 %v1501_v18, %v1451_v52  ;;  %v1534_v54 = vadd.f32 %v1502_v40, %v1452_v30  ;;  %v1535_v59 = vadd.f32 %v1503_v20, %v1453_v31  ;;  %v1536_v37 = vadd.f32 %v1504_v22, %v1454_v28  ;;  %v3453_v40 = vld [vmem:[#allocation17_spill] sm:$0xff] }
 0x2d7   :  { %v1537_v50 = vadd.f32 %v1505_v14, %v1455_v23  ;;  %v1538_v55 = vadd.f32 %v1506_v9, %v1456_v21  ;;  %v1539_v62 = vadd.f32 %v1507_v7, %v1457_v27  ;;  %v1540_v63 = vadd.f32 %v1508_v8, %v1458_v48 }
 0x2d8   :  { %v1541_v10 = vadd.f32 %v1509_v1, %v1459_v19  ;;  %v1542_v42 = vadd.f32 %v1510_v12, %v1460_v4  ;;  %v1543_v34 = vadd.f32 %v1511_v17, %v1461_v56  ;;  %v1544_v5 = vadd.f32 %v1512_v15, %v1462_v41 }
 0x2d9   :  { %v1545_v33 = vadd.f32 %v1513_v36, %v1463_v35  ;;  %v1546_v46 = vadd.f32 %v1514_v49, %v1464_v13  ;;  %v1547_v2 = vadd.f32 %v1515_v16, %v1465_v26  ;;  %v1548_v0 = vadd.f32 %v1516_v3, %v1466_v58 }
 0x2da   :  { %v1550_v44 = vstv %s3257_s12  ;;  %v3267_v30 = vstv %s3259_s13  ;;  %v3270_v28 = vstv %s3261_s14 }
 0x2db   :  { %v1551_v52 = vmul.f32 %v1550_v44, %v2989_v60  ;;  %v1552_v31 = vmul.f32 %v1550_v44, %v3401_v45  ;;  %3452 = vst [vmem:[#allocation18_spill] sm:$0xff] %v3270_v28  ;;  %v1553_v23 = vmul.f32 %v1550_v44, %v2995_v43  ;;  %v1554_v21 = vmul.f32 %v1550_v44, %v2998_v57 }
 0x2dc   :  { %v1555_v27 = vmul.f32 %v1550_v44, %v3402_v39  ;;  %v1556_v48 = vmul.f32 %v1550_v44, %v3403_v53  ;;  %v1557_v19 = vmul.f32 %v1550_v44, %v3404_v24  ;;  %v1558_v4 = vmul.f32 %v1550_v44, %v3405_v38 }
 0x2dd   :  { %v1559_v56 = vmul.f32 %v1550_v44, %v3406_v32  ;;  %v1560_v41 = vmul.f32 %v1550_v44, %v3407_v47  ;;  %v1561_v35 = vmul.f32 %v1550_v44, %v3437_v11  ;;  %v1562_v13 = vmul.f32 %v1550_v44, %v3448_v25 }
 0x2de   :  { %v1563_v26 = vmul.f32 %v1550_v44, %v3449_v6  ;;  %v1564_v58 = vmul.f32 %v1550_v44, %v3450_v61  ;;  %v1565_v18 = vmul.f32 %v1550_v44, %v3451_v29  ;;  %v1566_v20 = vmul.f32 %v1550_v44, %v3453_v40 }
 0x2df   :  { %v1583_v22 = vrot.slane %v1551_v52, 5  ;;  %v1584_v14 = vrot.slane %v1552_v31, 5  ;;  %v1585_v9 = vrot.slane %v1553_v23, 5  ;;  %v1586_v7 = vrot.slane %v1554_v21, 5 }
 0x2e0   :  { %v1587_v8 = vrot.slane %v1555_v27, 5  ;;  %v1588_v1 = vrot.slane %v1556_v48, 5  ;;  %v1589_v12 = vrot.slane %v1557_v19, 5  ;;  %v1590_v17 = vrot.slane %v1558_v4, 5 }
 0x2e1   :  { %v1591_v15 = vrot.slane %v1559_v56, 5  ;;  %v1592_v36 = vrot.slane %v1560_v41, 5  ;;  %v1593_v49 = vrot.slane %v1561_v35, 5  ;;  %v1594_v16 = vrot.slane %v1562_v13, 5 }
 0x2e2   :  { %v1595_v3 = vrot.slane %v1563_v26, 5  ;;  %v1596_v28 = vrot.slane %v1564_v58, 5  ;;  %v1597_v6 = vrot.slane %v1565_v18, 5  ;;  %v1598_v61 = vrot.slane %v1566_v20, 5 }
 0x2e3   :  { %v1615_v25 = vadd.f32 %v1583_v22, %v1533_v51  ;;  %v1616_v29 = vadd.f32 %v1584_v14, %v1534_v54  ;;  %v1617_v11 = vadd.f32 %v1585_v9, %v1535_v59  ;;  %v1618_v44 = vadd.f32 %v1586_v7, %v1536_v37 }
 0x2e4   :  { %v1619_v52 = vadd.f32 %v1587_v8, %v1537_v50  ;;  %v1620_v31 = vadd.f32 %v1588_v1, %v1538_v55  ;;  %v1621_v23 = vadd.f32 %v1589_v12, %v1539_v62  ;;  %v1622_v21 = vadd.f32 %v1590_v17, %v1540_v63  ;;  %v3454_v63 = vld [vmem:[#allocation12_spill] sm:$0xff] }
 0x2e5   :  { %v1623_v27 = vadd.f32 %v1591_v15, %v1541_v10  ;;  %v1624_v48 = vadd.f32 %v1592_v36, %v1542_v42  ;;  %v1625_v19 = vadd.f32 %v1593_v49, %v1543_v34  ;;  %v1626_v4 = vadd.f32 %v1594_v16, %v1544_v5  ;;  %v3455_v42 = vld [vmem:[#allocation13_spill] sm:$0xff]  ;;  %v3456_v5 = vld [vmem:[#allocation14_spill] sm:$0xff] }
 0x2e6   :  { %v1627_v56 = vadd.f32 %v1595_v3, %v1545_v33  ;;  %v1628_v41 = vadd.f32 %v1596_v28, %v1546_v46  ;;  %v1629_v35 = vadd.f32 %v1597_v6, %v1547_v2  ;;  %v1630_v13 = vadd.f32 %v1598_v61, %v1548_v0  ;;  %v3457_v46 = vld [vmem:[#allocation15_spill] sm:$0xff]  ;;  %v3458_v0 = vld [vmem:[#allocation16_spill] sm:$0xff] }
 0x2e7   :  { %v1633_v26 = vmul.f32 %v3267_v30, %v2989_v60  ;;  %v1634_v54 = vmul.f32 %v3267_v30, %v3401_v45  ;;  %v1635_v51 = vmul.f32 %v3267_v30, %v2995_v43  ;;  %v1636_v59 = vmul.f32 %v3267_v30, %v2998_v57 }
 0x2e8   :  { %v1637_v37 = vmul.f32 %v3267_v30, %v3402_v39  ;;  %v1638_v50 = vmul.f32 %v3267_v30, %v3403_v53  ;;  %v1639_v6 = vmul.f32 %v3267_v30, %v3404_v24  ;;  %v1640_v61 = vmul.f32 %v3267_v30, %v3405_v38 }
 0x2e9   :  { %v1641_v55 = vmul.f32 %v3267_v30, %v3406_v32  ;;  %v1642_v62 = vmul.f32 %v3267_v30, %v3407_v47  ;;  %v1643_v10 = vmul.f32 %v3267_v30, %v3454_v63  ;;  %v1644_v34 = vmul.f32 %v3267_v30, %v3455_v42 }
 0x2ea   :  { %v1645_v33 = vmul.f32 %v3267_v30, %v3456_v5  ;;  %v1646_v2 = vmul.f32 %v3267_v30, %v3457_v46  ;;  %v1647_v28 = vmul.f32 %v3267_v30, %v3458_v0  ;;  %v1648_v58 = vmul.f32 %v3267_v30, %v3453_v40 }
 0x2eb   :  { %v1665_v18 = vrot.slane %v1633_v26, 6  ;;  %v1666_v20 = vrot.slane %v1634_v54, 6  ;;  %v1667_v22 = vrot.slane %v1635_v51, 6  ;;  %v1668_v14 = vrot.slane %v1636_v59, 6 }
 0x2ec   :  { %v1669_v9 = vrot.slane %v1637_v37, 6  ;;  %v1670_v7 = vrot.slane %v1638_v50, 6  ;;  %v1671_v8 = vrot.slane %v1639_v6, 6  ;;  %v1672_v1 = vrot.slane %v1640_v61, 6 }
 0x2ed   :  { %v1673_v12 = vrot.slane %v1641_v55, 6  ;;  %v1674_v17 = vrot.slane %v1642_v62, 6  ;;  %v1675_v15 = vrot.slane %v1643_v10, 6  ;;  %v1676_v36 = vrot.slane %v1644_v34, 6 }
 0x2ee   :  { %v1677_v49 = vrot.slane %v1645_v33, 6  ;;  %v1678_v16 = vrot.slane %v1646_v2, 6  ;;  %v1679_v3 = vrot.slane %v1647_v28, 6  ;;  %v1680_v46 = vrot.slane %v1648_v58, 6  ;;  %v3459_v2 = vld [vmem:[#allocation18_spill] sm:$0xff] }
 0x2ef   :  { %v1697_v0 = vadd.f32 %v1665_v18, %v1615_v25  ;;  %v3318_v5 = vadd.f32 %v1666_v20, %v1616_v29  ;;  %v1699_v30 = vadd.f32 %v1667_v22, %v1617_v11  ;;  %v1700_v26 = vadd.f32 %v1668_v14, %v1618_v44 }
 0x2f0   :  { %v1701_v54 = vadd.f32 %v1669_v9, %v1619_v52  ;;  %v1702_v51 = vadd.f32 %v1670_v7, %v1620_v31  ;;  %v1703_v59 = vadd.f32 %v1671_v8, %v1621_v23  ;;  %v1704_v37 = vadd.f32 %v1672_v1, %v1622_v21  ;;  %v3460_v23 = vld [vmem:[#allocation14_spill] sm:$0xff]  ;;  %v3461_v21 = vld [vmem:[#allocation15_spill] sm:$0xff] }
 0x2f1   :  { %v1705_v50 = vadd.f32 %v1673_v12, %v1623_v27  ;;  %v1706_v6 = vadd.f32 %v1674_v17, %v1624_v48  ;;  %v1707_v61 = vadd.f32 %v1675_v15, %v1625_v19  ;;  %v1708_v55 = vadd.f32 %v1676_v36, %v1626_v4 }
 0x2f2   :  { %v1709_v62 = vadd.f32 %v1677_v49, %v1627_v56  ;;  %v1710_v10 = vadd.f32 %v1678_v16, %v1628_v41  ;;  %v1711_v34 = vadd.f32 %v1679_v3, %v1629_v35  ;;  %v1712_v33 = vadd.f32 %v1680_v46, %v1630_v13 }
 0x2f3   :  { %v1715_v28 = vmul.f32 %v3459_v2, %v2989_v60  ;;  %v1717_v25 = vmul.f32 %v3459_v2, %v2995_v43  ;;  %v1718_v11 = vmul.f32 %v3459_v2, %v2998_v57  ;;  %v1719_v29 = vmul.f32 %v3459_v2, %v3402_v39 }
 0x2f4   :  { %v1720_v44 = vmul.f32 %v3459_v2, %v3403_v53  ;;  %v1721_v52 = vmul.f32 %v3459_v2, %v3404_v24  ;;  %v1722_v31 = vmul.f32 %v3459_v2, %v3405_v38  ;;  %v1723_v60 = vmul.f32 %v3459_v2, %v3406_v32  ;;  %v3462_v32 = vld [vmem:[#allocation16_spill] sm:$0xff] }
 0x2f5   :  { %v1724_v43 = vmul.f32 %v3459_v2, %v3407_v47  ;;  %v1725_v57 = vmul.f32 %v3459_v2, %v3454_v63  ;;  %v1716_v39 = vmul.f32 %v3459_v2, %v3401_v45  ;;  %v1726_v53 = vmul.f32 %v3459_v2, %v3455_v42 }
 0x2f6   :  { %v1727_v24 = vmul.f32 %v3459_v2, %v3460_v23  ;;  %v1728_v38 = vmul.f32 %v3459_v2, %v3461_v21  ;;  %v1729_v27 = vmul.f32 %v3459_v2, %v3462_v32  ;;  %v1730_v47 = vmul.f32 %v3459_v2, %v3453_v40 }
 0x2f7   :  { %v1747_v48 = vrot.slane %v1715_v28, 7  ;;  %v1749_v19 = vrot.slane %v1717_v25, 7  ;;  %v1750_v45 = vrot.slane %v1718_v11, 7  ;;  %v1751_v4 = vrot.slane %v1719_v29, 7 }
 0x2f8   :  { %v1752_v56 = vrot.slane %v1720_v44, 7  ;;  %v1753_v41 = vrot.slane %v1721_v52, 7  ;;  %v1754_v35 = vrot.slane %v1722_v31, 7  ;;  %v1755_v13 = vrot.slane %v1723_v60, 7 }
 0x2f9   :  { %v1756_v63 = vrot.slane %v1724_v43, 7  ;;  %v1757_v42 = vrot.slane %v1725_v57, 7  ;;  %v1748_v46 = vrot.slane %v1716_v39, 7  ;;  %v1758_v58 = vrot.slane %v1726_v53, 7 }
 0x2fa   :  { %v1759_v18 = vrot.slane %v1727_v24, 7  ;;  %v1760_v20 = vrot.slane %v1728_v38, 7  ;;  %v1761_v22 = vrot.slane %v1729_v27, 7  ;;  %v1762_v40 = vrot.slane %v1730_v47, 7 }
 0x2fb   :  { %v1779_v14 = vadd.f32 %v1747_v48, %v1697_v0  ;;  %v1781_v9 = vadd.f32 %v1749_v19, %v1699_v30  ;;  %v1782_v7 = vadd.f32 %v1750_v45, %v1700_v26  ;;  %v1783_v8 = vadd.f32 %v1751_v4, %v1701_v54 }
 0x2fc   :  { %v1784_v1 = vadd.f32 %v1752_v56, %v1702_v51  ;;  %v1785_v12 = vadd.f32 %v1753_v41, %v1703_v59  ;;  %v1786_v17 = vadd.f32 %v1754_v35, %v1704_v37  ;;  %v1787_v15 = vadd.f32 %v1755_v13, %v1705_v50 }
 0x2fd   :  { %v1788_v36 = vadd.f32 %v1756_v63, %v1706_v6  ;;  %v1789_v49 = vadd.f32 %v1757_v42, %v1707_v61  ;;  %v1780_v16 = vadd.f32 %v1748_v46, %v3318_v5  ;;  %v1790_v3 = vadd.f32 %v1758_v58, %v1708_v55 }
 0x2fe   :  { %v1791_v2 = vadd.f32 %v1759_v18, %v1709_v62  ;;  %v1792_v28 = vadd.f32 %v1760_v20, %v1710_v10  ;;  %v1793_v25 = vadd.f32 %v1761_v22, %v1711_v34  ;;  %v1811_v11 = vrot.slane %v1781_v9, 7 }
 0x2ff   :  { %v1814_v29 = vrot.slane %v1783_v8, 6  ;;  %v1817_v44 = vrot.slane %v1785_v12, 5  ;;  %v1794_v0 = vadd.f32 %v1762_v40, %v1712_v33  ;;  %v1820_v30 = vrot.slane %v1787_v15, 4 }
 0x300   :  { %v1823_v52 = vrot.slane %v1789_v49, 3  ;;  %v1832_v26 = vrot.slane %v1782_v7, 7  ;;  %v1813_v54 = vsel %vm1812_vm0, %v1811_v11, %v1779_v14  ;;  %v1834_v51 = vrot.slane %v1784_v1, 6 }
 0x301   :  { %v1836_v59 = vrot.slane %v1786_v17, 5  ;;  %v1838_v37 = vrot.slane %v1788_v36, 4  ;;  %v1816_v50 = vsel %vm1815_vm1, %v1814_v29, %v1813_v54  ;;  %v1826_v6 = vrot.slane %v1791_v2, 2 }
 0x302   :  { %v1833_v5 = vsel %vm1812_vm0, %v1832_v26, %v1780_v16  ;;  %v1840_v61 = vrot.slane %v1790_v3, 3  ;;  %v1819_v55 = vsel %vm1818_vm2, %v1817_v44, %v1816_v50  ;;  %v1829_v62 = vrot.slane %v1793_v25, 1 }
 0x303   :  { %v1835_v10 = vsel %vm1815_vm1, %v1834_v51, %v1833_v5  ;;  %v1842_v34 = vrot.slane %v1792_v28, 2  ;;  %v1822_v33 = vsel %vm1821_vm3, %v1820_v30, %v1819_v55  ;;  %v1844_v60 = vrot.slane %v1794_v0, 1 }
 0x304   :  { %v1837_v31 = vsel %vm1818_vm2, %v1836_v59, %v1835_v10  ;;  %v1825_v43 = vsel %vm1824_vm4, %v1823_v52, %v1822_v33 }
 0x305   :  { %v1839_v57 = vsel %vm1821_vm3, %v1838_v37, %v1837_v31  ;;  %v1828_v39 = vsel %vm1827_vm5, %v1826_v6, %v1825_v43 }
 0x306   :  { %v1841_v53 = vsel %vm1824_vm4, %v1840_v61, %v1839_v57  ;;  %v1831_v23 = vsel %vm1830_vm6, %v1829_v62, %v1828_v39 }
 0x307   :  { %v1843_v24 = vsel %vm1827_vm5, %v1842_v34, %v1841_v53  ;;  %1848 = vst [vmem:[#allocation8] sm:$0xff] %v1831_v23 }
 0x308   :  { %v1845_v21 = vsel %vm1830_vm6, %v1844_v60, %v1843_v24 }
 0x309   :  { %1849 = vst [vmem:[#allocation8 + $0x8] sm:$0xff] %v1845_v21 }
 0x30a   :  { %2295 = shalt.err (!%p2292_p6)
}
 0x30b   :  { %s2296_s20 = scalar_lea.hbm %s3380_s3, 256 }
 0x30c   :  { %p2297_p7 = scmp.ne.s32.totalorder %s3380_s3, %s2296_s20  ;;  %p2300_p8 = scmp.lt.u32.totalorder %s2296_s20, %s3380_s3 }
 0x30e   :  { %p2302_p9 = pnand %p2300_p8, %p2297_p7 }
 0x310   :  { %2305 = shalt.err (!%p2302_p9)
}
 0x311   :  { %1859 = dma.vmem_to_hbm [thread:$0]  %s1857_s16, 256, %s3380_s3, [#allocation5]  }
 0x312   :  { %2378 = dma.done.wait [#allocation5], 256  }
 0x313   :  { %2379 = vsyncadd [#allocation5], 4294967040 }
 0x314   :  { %1863 = vsyncpa [#allocation4], 1 }
 0x315   :  { %1864 = vsyncpa [#allocation5], 1 }
 0x316   :  { %1865 = vsyncpa [#allocation6], 1 }

</bundles_post_ra>
